<compile_context>
chip_gen: v7x
topology: tpu7x:2x2x1
jax: 0.10.0
libtpu: 0.0.40
codegen_flags: <defaults>
</compile_context>

<pallas_src>
import functools
import math

import numpy as np

import jax
import jax.numpy as jnp
from jax.experimental import pallas as pl
from jax.experimental.pallas import tpu as pltpu

BN_EPS = 1e-5   # PyTorch BatchNorm2d default
LANE = 128


def _round_up(x, m):
    return (x + m - 1) // m * m


# ---------------------------------------------------------------------------
# Pallas kernel: fused (Conv3x3 valid -> BatchNorm(train) -> ReLU) x 2,
# single grid step, whole batch resident in VMEM.
# ---------------------------------------------------------------------------
def _double_conv_kernel(x_ref, m1_ref, m2_ref,
                        w1_ref, sel1_ref, selT1_ref, g1_ref, b1_ref,
                        w2_ref, sel2_ref, selT2_ref, g2_ref, b2_ref,
                        o_ref, *, inv_cnt1, inv_cnt2):
    f32 = jnp.float32

    def conv_bn_relu(a, valid, w, sel, selT, gamma, beta, inv_cnt):
        # a:     (rows, 128) activation slab; row = one spatial row, channel-minor
        #        lanes, images stacked along rows.
        # valid: (rows-2, 1) f32 mask; 0 for rows whose 3x3 window crosses an
        #        image boundary (those rows are discarded by the wrapper).
        # w:     (3*128, 128) bf16 fused block-banded weights (3 kh bands on K).
        rows = a.shape[0]
        r_out = rows - 2
        ab = a.astype(jnp.bfloat16)
        # Implicit im2col: one MXU matmul with K = 3*128 (lane-aligned concat of
        # the three row-shifted slices -> no 9x patch expansion, no recompute).
        lhs = jnp.concatenate(
            [ab[0:r_out, :], ab[1:r_out + 1, :], ab[2:r_out + 2, :]], axis=-1)
        y = jnp.dot(lhs, w, preferred_element_type=f32)            # (r_out, 128)

        # ---- train-mode BatchNorm: mean first, then centered variance ----
        col_sum = jnp.sum(y * valid, axis=0, keepdims=True)        # (1, 128)
        mean_c = jnp.dot(col_sum, sel, preferred_element_type=f32) * inv_cnt
        mean_w = jnp.dot(mean_c, selT, preferred_element_type=f32)  # (1, 128)
        d = (y - mean_w) * valid                                    # pad cols: 0
        col_sq = jnp.sum(d * d, axis=0, keepdims=True)
        var_c = jnp.dot(col_sq, sel, preferred_element_type=f32) * inv_cnt

        scale_c = gamma * jax.lax.rsqrt(var_c + BN_EPS)             # (1, Cout)
        shift_c = beta - mean_c * scale_c
        scale_w = jnp.dot(scale_c, selT, preferred_element_type=f32)  # (1, 128)
        shift_w = jnp.dot(shift_c, selT, preferred_element_type=f32)
        # Padded lanes have scale = shift = 0, so they stay exactly 0 and feed
        # zero-weight columns of the next stage.
        return jnp.maximum(y * scale_w + shift_w, 0.0)

    a1 = conv_bn_relu(x_ref[...], m1_ref[...], w1_ref[...], sel1_ref[...],
                      selT1_ref[...], g1_ref[...], b1_ref[...], inv_cnt1)
    a2 = conv_bn_relu(a1, m2_ref[...], w2_ref[...], sel2_ref[...],
                      selT2_ref[...], g2_ref[...], b2_ref[...], inv_cnt2)
    o_ref[...] = a2.astype(o_ref.dtype)


def _row_mask(n_rows, row_stride, ho):
    r = jnp.arange(n_rows) % row_stride
    return (r < ho).astype(jnp.float32).reshape(n_rows, 1)


def _double_conv_call(xf, p):
    """xf: (N*H, row1) f32 channel-minor slab -> (N*H - 4, wocp2) f32 slab."""
    NH, _row1 = xf.shape
    H = p["H"]
    N = NH // H
    R1, R2 = NH - 2, NH - 4
    wocp2 = p["wocp2"]
    inv1 = 1.0 / float(N * p["Ho1"] * p["Wo1"])
    inv2 = 1.0 / float(N * p["Ho2"] * p["Wo2"])

    m1 = _row_mask(R1, H, p["Ho1"])
    m2 = _row_mask(R2, H, p["Ho2"])

    kernel = functools.partial(_double_conv_kernel,
                               inv_cnt1=inv1, inv_cnt2=inv2)

    def full2d(shape):
        return pl.BlockSpec(shape, lambda i: (0, 0))

    operands = (xf, m1, m2,
                p["w1"], p["sel1"], p["selT1"], p["g1"], p["b1"],
                p["w2"], p["sel2"], p["selT2"], p["g2"], p["b2"])

    # TODO(synk): for large N, tile the row dimension over a "parallel" grid axis
    # with per-core partial BN stats (v7x dual TensorCore); at these shapes a
    # single fused invocation (everything VMEM-resident) is fastest.
    return pl.pallas_call(
        kernel,
        out_shape=jax.ShapeDtypeStruct((R2, wocp2), jnp.float32),
        grid_spec=pltpu.PrefetchScalarGridSpec(
            num_scalar_prefetch=0,
            grid=(1,),
            in_specs=[full2d(op.shape) for op in operands],
            out_specs=full2d((R2, wocp2)),
        ),
        compiler_params=pltpu.CompilerParams(
            dimension_semantics=("arbitrary",),
            vmem_limit_bytes=64 * 1024 * 1024,
        ),
    )(*operands)


# ---------------------------------------------------------------------------
# One-time host-side preprocessing (hoisted out of the forward pass)
# ---------------------------------------------------------------------------
def _build_fused_bands(w_oihw, W_in, P_in, WoCp):
    """(Cout, Cin, 3, 3) -> (3 * P_in*Cin, WoCp) fused block-banded matrix.

    band[kh*row_in + win*Cin + c, wo*Cout + o] = W[o, c, kh, win - wo]
    for win - wo in {0, 1, 2}; padded rows/columns are zero.
    """
    w = np.asarray(jax.device_get(w_oihw), np.float32)
    Cout, Cin, KH, KW = w.shape
    Wo = W_in - (KW - 1)
    row_in = P_in * Cin
    wt = np.transpose(w, (2, 3, 1, 0))              # (KH, KW, Cin, Cout)
    out = np.zeros((KH * row_in, WoCp), np.float32)
    for kh in range(KH):
        for kw in range(KW):
            for wo in range(Wo):
                win = wo + kw
                r0 = kh * row_in + win * Cin
                c0 = wo * Cout
                out[r0:r0 + Cin, c0:c0 + Cout] = wt[kh, kw]
    return out


def _build_channel_maps(Wo, Cout, WoCp):
    """0/1 fold (WoCp, Cout) and broadcast (Cout, WoCp) maps; pad region is 0."""
    eye = np.eye(Cout, dtype=np.float32)
    sel = np.zeros((WoCp, Cout), np.float32)
    selT = np.zeros((Cout, WoCp), np.float32)
    for wo in range(Wo):
        sel[wo * Cout:(wo + 1) * Cout, :] = eye
        selT[:, wo * Cout:(wo + 1) * Cout] = eye
    return sel, selT


def prepare_down_params(stage_params, H, W):
    """Precompute fused banded weights / fold maps once (not per forward call)."""
    (w1, _b1, g1, be1), (w2, _b2, g2, be2) = stage_params
    Cin, Cmid, Cout = w1.shape[1], w1.shape[0], w2.shape[0]
    assert w2.shape[1] == Cmid
    Ho1, Wo1, Ho2, Wo2 = H - 2, W - 2, H - 4, W - 4
    row1 = _round_up(W * Cin, LANE)
    wocp1 = _round_up(Wo1 * Cmid, LANE)
    wocp2 = _round_up(Wo2 * Cout, LANE)
    assert row1 % Cin == 0 and wocp1 % Cmid == 0, "channel count must divide 128"
    w1f = _build_fused_bands(w1, W_in=W, P_in=row1 // Cin, WoCp=wocp1)
    w2f = _build_fused_bands(w2, W_in=Wo1, P_in=wocp1 // Cmid, WoCp=wocp2)
    sel1, selT1 = _build_channel_maps(Wo1, Cmid, wocp1)
    sel2, selT2 = _build_channel_maps(Wo2, Cout, wocp2)
    return dict(
        H=H, W=W, Cin=Cin, Cout=Cout,
        Ho1=Ho1, Wo1=Wo1, Ho2=Ho2, Wo2=Wo2,
        row1=row1, wocp1=wocp1, wocp2=wocp2,
        w1=jnp.asarray(w1f, jnp.bfloat16),
        w2=jnp.asarray(w2f, jnp.bfloat16),
        sel1=jnp.asarray(sel1), selT1=jnp.asarray(selT1),
        sel2=jnp.asarray(sel2), selT2=jnp.asarray(selT2),
        g1=jnp.asarray(g1, jnp.float32).reshape(1, Cmid),
        b1=jnp.asarray(be1, jnp.float32).reshape(1, Cmid),
        g2=jnp.asarray(g2, jnp.float32).reshape(1, Cout),
        b2=jnp.asarray(be2, jnp.float32).reshape(1, Cout),
    )


def down_forward(x_nchw, prep):
    """Down / DoubleConv forward: (N, Cin, H, W) -> (N, Cout, H-4, W-4)."""
    N, Cin, H, W = x_nchw.shape
    assert (H, W, Cin) == (prep["H"], prep["W"], prep["Cin"])
    # NHWC channel-minor rows, lane-padded to a multiple of 128, images stacked.
    x = jnp.transpose(x_nchw, (0, 2, 3, 1)).reshape(N, H, W * Cin)
    x = jnp.pad(x, ((0, 0), (0, 0), (0, prep["row1"] - W * Cin)))
    xf = x.reshape(N * H, prep["row1"])
    slab = _double_conv_call(xf, prep)                     # (N*H - 4, wocp2)
    Ho2, Wo2, Cout = prep["Ho2"], prep["Wo2"], prep["Cout"]
    imgs = [slab[n * H:n * H + Ho2, :Wo2 * Cout].reshape(Ho2, Wo2, Cout)
            for n in range(N)]
    y = jnp.stack(imgs)                                    # (N, Ho2, Wo2, Cout)
    return jnp.transpose(y, (0, 3, 1, 2))                  # back to NCHW


# ---------------------------------------------------------------------------
# Parameter init (PyTorch-style) and pure-JAX f32 reference
# ---------------------------------------------------------------------------
def init_conv_params(key, cin, cout):
    """Deterministic Conv2d-style init (kaiming-uniform-ish bounds) + BN init."""
    k1, k2 = jax.random.split(key)
    fan_in = cin * 9
    bound = 1.0 / math.sqrt(fan_in)
    w = jax.random.uniform(k1, (cout, cin, 3, 3), jnp.float32, -bound, bound)
    b = jax.random.uniform(k2, (cout,), jnp.float32, -bound, bound)
    gamma = jnp.ones((cout,), jnp.float32)
    beta = jnp.zeros((cout,), jnp.float32)
    return w, b, gamma, beta


def down_reference(x_nchw, stage_params):
    x = x_nchw
    for (w, b, gamma, beta) in stage_params:
        y = jax.lax.conv_general_dilated(
            x, w, window_strides=(1, 1), padding="VALID",
            dimension_numbers=("NCHW", "OIHW", "NCHW"))
        y = y + b[None, :, None, None]          # conv bias (cancels in train BN)
        mean = jnp.mean(y, axis=(0, 2, 3), keepdims=True)
        var = jnp.mean((y - mean) ** 2, axis=(0, 2, 3), keepdims=True)
        y = (y - mean) * jax.lax.rsqrt(var + BN_EPS)
        y = y * gamma[None, :, None, None] + beta[None, :, None, None]
        x = jnp.maximum(y, 0.0)
    return x


if __name__ == "__main__":
    key = jax.random.PRNGKey(0)
    kx, k1, k2 = jax.random.split(key, 3)

    N, Cin, H, W = 2, 4, 16, 16
    Cout = 8    # Down(4, 8) with default stride=1, padding=0

    x = jax.random.normal(kx, (N, Cin, H, W), jnp.float32)
    params = [
        init_conv_params(k1, Cin, Cout),    # conv1: 4 -> 8 (mid_channels == out)
        init_conv_params(k2, Cout, Cout),   # conv2: 8 -> 8
    ]

    prep = prepare_down_params(params, H, W)          # hoisted host-side prep
    fwd = jax.jit(functools.partial(down_forward, prep=prep))

    out = jax.block_until_ready(fwd(x))
    assert out.shape == (N, Cout, H - 4, W - 4), out.shape

    ref = jax.block_until_ready(down_reference(x, params))
    # bf16 MXU operands (x, banded weights, stage-1 activation) -> small drift
    # vs the pure-f32 reference; this is an intentional precision choice.
    assert jnp.allclose(out, ref, atol=5e-2, rtol=5e-2), (
        float(jnp.max(jnp.abs(out - ref))))

    print("KERNEL_OK")
</pallas_src>

<mosaic_0001>
module attributes {stable_mosaic.version = 11 : i64} {
  func.func @_double_conv_kernel(%arg0: i32, %arg1: memref<32x128xf32, #tpu.memory_space<vmem>>, %arg2: memref<30x1xf32, #tpu.memory_space<vmem>>, %arg3: memref<28x1xf32, #tpu.memory_space<vmem>>, %arg4: memref<384x128xbf16, #tpu.memory_space<vmem>>, %arg5: memref<128x8xf32, #tpu.memory_space<vmem>>, %arg6: memref<8x128xf32, #tpu.memory_space<vmem>>, %arg7: memref<1x8xf32, #tpu.memory_space<vmem>>, %arg8: memref<1x8xf32, #tpu.memory_space<vmem>>, %arg9: memref<384x128xbf16, #tpu.memory_space<vmem>>, %arg10: memref<128x8xf32, #tpu.memory_space<vmem>>, %arg11: memref<8x128xf32, #tpu.memory_space<vmem>>, %arg12: memref<1x8xf32, #tpu.memory_space<vmem>>, %arg13: memref<1x8xf32, #tpu.memory_space<vmem>>, %arg14: memref<28x128xf32, #tpu.memory_space<vmem>>) attributes {dimension_semantics = [#tpu.dimension_semantics<arbitrary>], iteration_bounds = array<i64: 1>, scalar_prefetch = 0 : i64, scratch_operands = 0 : i64, tpu.core_type = #tpu.core_type<tc>, window_params = [{pipeline_mode = #tpu.pipeline_mode<synchronous>, transform_indices = @transform_0, window_bounds = array<i64: 32, 128>}, {pipeline_mode = #tpu.pipeline_mode<synchronous>, transform_indices = @transform_1, window_bounds = array<i64: 30, 1>}, {pipeline_mode = #tpu.pipeline_mode<synchronous>, transform_indices = @transform_2, window_bounds = array<i64: 28, 1>}, {pipeline_mode = #tpu.pipeline_mode<synchronous>, transform_indices = @transform_3, window_bounds = array<i64: 384, 128>}, {pipeline_mode = #tpu.pipeline_mode<synchronous>, transform_indices = @transform_4, window_bounds = array<i64: 128, 8>}, {pipeline_mode = #tpu.pipeline_mode<synchronous>, transform_indices = @transform_5, window_bounds = array<i64: 8, 128>}, {pipeline_mode = #tpu.pipeline_mode<synchronous>, transform_indices = @transform_6, window_bounds = array<i64: 1, 8>}, {pipeline_mode = #tpu.pipeline_mode<synchronous>, transform_indices = @transform_7, window_bounds = array<i64: 1, 8>}, {pipeline_mode = #tpu.pipeline_mode<synchronous>, transform_indices = @transform_8, window_bounds = array<i64: 384, 128>}, {pipeline_mode = #tpu.pipeline_mode<synchronous>, transform_indices = @transform_9, window_bounds = array<i64: 128, 8>}, {pipeline_mode = #tpu.pipeline_mode<synchronous>, transform_indices = @transform_10, window_bounds = array<i64: 8, 128>}, {pipeline_mode = #tpu.pipeline_mode<synchronous>, transform_indices = @transform_11, window_bounds = array<i64: 1, 8>}, {pipeline_mode = #tpu.pipeline_mode<synchronous>, transform_indices = @transform_12, window_bounds = array<i64: 1, 8>}, {pipeline_mode = #tpu.pipeline_mode<synchronous>, transform_indices = @transform_13, window_bounds = array<i64: 28, 128>}]} {
    %c0 = arith.constant 0 : index
    %c0_0 = arith.constant 0 : index
    %0 = vector.load %arg1[%c0, %c0_0] : memref<32x128xf32, #tpu.memory_space<vmem>>, vector<32x128xf32>
    %c0_1 = arith.constant 0 : index
    %c0_2 = arith.constant 0 : index
    %1 = vector.load %arg2[%c0_1, %c0_2] : memref<30x1xf32, #tpu.memory_space<vmem>>, vector<30x1xf32>
    %c0_3 = arith.constant 0 : index
    %c0_4 = arith.constant 0 : index
    %2 = vector.load %arg4[%c0_3, %c0_4] : memref<384x128xbf16, #tpu.memory_space<vmem>>, vector<384x128xbf16>
    %c0_5 = arith.constant 0 : index
    %c0_6 = arith.constant 0 : index
    %3 = vector.load %arg5[%c0_5, %c0_6] : memref<128x8xf32, #tpu.memory_space<vmem>>, vector<128x8xf32>
    %c0_7 = arith.constant 0 : index
    %c0_8 = arith.constant 0 : index
    %4 = vector.load %arg6[%c0_7, %c0_8] : memref<8x128xf32, #tpu.memory_space<vmem>>, vector<8x128xf32>
    %c0_9 = arith.constant 0 : index
    %c0_10 = arith.constant 0 : index
    %5 = vector.load %arg7[%c0_9, %c0_10] : memref<1x8xf32, #tpu.memory_space<vmem>>, vector<1x8xf32>
    %c0_11 = arith.constant 0 : index
    %c0_12 = arith.constant 0 : index
    %6 = vector.load %arg8[%c0_11, %c0_12] : memref<1x8xf32, #tpu.memory_space<vmem>>, vector<1x8xf32>
    %7 = arith.truncf %0 : vector<32x128xf32> to vector<32x128xbf16>
    %8 = vector.extract_strided_slice %7 {offsets = [0, 0], sizes = [30, 128], strides = [1, 1]} : vector<32x128xbf16> to vector<30x128xbf16>
    %9 = vector.extract_strided_slice %7 {offsets = [1, 0], sizes = [30, 128], strides = [1, 1]} : vector<32x128xbf16> to vector<30x128xbf16>
    %10 = vector.extract_strided_slice %7 {offsets = [2, 0], sizes = [30, 128], strides = [1, 1]} : vector<32x128xbf16> to vector<30x128xbf16>
    %11 = tpu.concatenate %8, %9, %10 in 1 : vector<30x128xbf16>, vector<30x128xbf16>, vector<30x128xbf16> -> vector<30x384xbf16>
    %cst = arith.constant dense<0.000000e+00> : vector<30x128xf32>
    %12 = tpu.matmul %11, %2, %cst {dimension_numbers = #tpu.dot_dimension_numbers<[1], [0], [0], [1], [0, 0, 1, 1], [], []>} : vector<30x384xbf16>, vector<384x128xbf16>, vector<30x128xf32> -> vector<30x128xf32>
    %13 = vector.broadcast %1 : vector<30x1xf32> to vector<30x128xf32>
    %14 = arith.mulf %12, %13 : vector<30x128xf32>
    %cst_13 = arith.constant dense<0.000000e+00> : vector<128xf32>
    %15 = vector.multi_reduction <add>, %14, %cst_13 [0] : vector<30x128xf32> to vector<128xf32>
    %16 = vector.shape_cast %15 : vector<128xf32> to vector<1x128xf32>
    %cst_14 = arith.constant dense<0.000000e+00> : vector<1x8xf32>
    %17 = tpu.matmul %16, %3, %cst_14 {dimension_numbers = #tpu.dot_dimension_numbers<[1], [0], [0], [1], [0, 0, 1, 1], [], []>} : vector<1x128xf32>, vector<128x8xf32>, vector<1x8xf32> -> vector<1x8xf32>
    %cst_15 = arith.constant 0.00255102036 : f32
    %18 = vector.broadcast %cst_15 : f32 to vector<1x8xf32>
    %19 = arith.mulf %17, %18 : vector<1x8xf32>
    %cst_16 = arith.constant dense<0.000000e+00> : vector<1x128xf32>
    %20 = tpu.matmul %19, %4, %cst_16 {dimension_numbers = #tpu.dot_dimension_numbers<[1], [0], [0], [1], [0, 0, 1, 1], [], []>} : vector<1x8xf32>, vector<8x128xf32>, vector<1x128xf32> -> vector<1x128xf32>
    %21 = vector.broadcast %20 : vector<1x128xf32> to vector<30x128xf32>
    %22 = arith.subf %12, %21 : vector<30x128xf32>
    %23 = vector.broadcast %1 : vector<30x1xf32> to vector<30x128xf32>
    %24 = arith.mulf %22, %23 : vector<30x128xf32>
    %25 = arith.mulf %24, %24 : vector<30x128xf32>
    %cst_17 = arith.constant dense<0.000000e+00> : vector<128xf32>
    %26 = vector.multi_reduction <add>, %25, %cst_17 [0] : vector<30x128xf32> to vector<128xf32>
    %27 = vector.shape_cast %26 : vector<128xf32> to vector<1x128xf32>
    %cst_18 = arith.constant dense<0.000000e+00> : vector<1x8xf32>
    %28 = tpu.matmul %27, %3, %cst_18 {dimension_numbers = #tpu.dot_dimension_numbers<[1], [0], [0], [1], [0, 0, 1, 1], [], []>} : vector<1x128xf32>, vector<128x8xf32>, vector<1x8xf32> -> vector<1x8xf32>
    %cst_19 = arith.constant 0.00255102036 : f32
    %29 = vector.broadcast %cst_19 : f32 to vector<1x8xf32>
    %30 = arith.mulf %28, %29 : vector<1x8xf32>
    %cst_20 = arith.constant 9.99999974E-6 : f32
    %31 = vector.broadcast %cst_20 : f32 to vector<1x8xf32>
    %32 = arith.addf %30, %31 : vector<1x8xf32>
    %33 = math.rsqrt %32 : vector<1x8xf32>
    %34 = arith.mulf %5, %33 : vector<1x8xf32>
    %35 = arith.mulf %19, %34 : vector<1x8xf32>
    %36 = arith.subf %6, %35 : vector<1x8xf32>
    %cst_21 = arith.constant dense<0.000000e+00> : vector<1x128xf32>
    %37 = tpu.matmul %34, %4, %cst_21 {dimension_numbers = #tpu.dot_dimension_numbers<[1], [0], [0], [1], [0, 0, 1, 1], [], []>} : vector<1x8xf32>, vector<8x128xf32>, vector<1x128xf32> -> vector<1x128xf32>
    %cst_22 = arith.constant dense<0.000000e+00> : vector<1x128xf32>
    %38 = tpu.matmul %36, %4, %cst_22 {dimension_numbers = #tpu.dot_dimension_numbers<[1], [0], [0], [1], [0, 0, 1, 1], [], []>} : vector<1x8xf32>, vector<8x128xf32>, vector<1x128xf32> -> vector<1x128xf32>
    %39 = vector.broadcast %37 : vector<1x128xf32> to vector<30x128xf32>
    %40 = arith.mulf %12, %39 : vector<30x128xf32>
    %41 = vector.broadcast %38 : vector<1x128xf32> to vector<30x128xf32>
    %42 = arith.addf %40, %41 : vector<30x128xf32>
    %cst_23 = arith.constant 0.000000e+00 : f32
    %43 = vector.broadcast %cst_23 : f32 to vector<30x128xf32>
    %44 = arith.maximumf %42, %43 : vector<30x128xf32>
    %c0_24 = arith.constant 0 : index
    %c0_25 = arith.constant 0 : index
    %45 = vector.load %arg3[%c0_24, %c0_25] : memref<28x1xf32, #tpu.memory_space<vmem>>, vector<28x1xf32>
    %c0_26 = arith.constant 0 : index
    %c0_27 = arith.constant 0 : index
    %46 = vector.load %arg9[%c0_26, %c0_27] : memref<384x128xbf16, #tpu.memory_space<vmem>>, vector<384x128xbf16>
    %c0_28 = arith.constant 0 : index
    %c0_29 = arith.constant 0 : index
    %47 = vector.load %arg10[%c0_28, %c0_29] : memref<128x8xf32, #tpu.memory_space<vmem>>, vector<128x8xf32>
    %c0_30 = arith.constant 0 : index
    %c0_31 = arith.constant 0 : index
    %48 = vector.load %arg11[%c0_30, %c0_31] : memref<8x128xf32, #tpu.memory_space<vmem>>, vector<8x128xf32>
    %c0_32 = arith.constant 0 : index
    %c0_33 = arith.constant 0 : index
    %49 = vector.load %arg12[%c0_32, %c0_33] : memref<1x8xf32, #tpu.memory_space<vmem>>, vector<1x8xf32>
    %c0_34 = arith.constant 0 : index
    %c0_35 = arith.constant 0 : index
    %50 = vector.load %arg13[%c0_34, %c0_35] : memref<1x8xf32, #tpu.memory_space<vmem>>, vector<1x8xf32>
    %51 = arith.truncf %44 : vector<30x128xf32> to vector<30x128xbf16>
    %52 = vector.extract_strided_slice %51 {offsets = [0, 0], sizes = [28, 128], strides = [1, 1]} : vector<30x128xbf16> to vector<28x128xbf16>
    %53 = vector.extract_strided_slice %51 {offsets = [1, 0], sizes = [28, 128], strides = [1, 1]} : vector<30x128xbf16> to vector<28x128xbf16>
    %54 = vector.extract_strided_slice %51 {offsets = [2, 0], sizes = [28, 128], strides = [1, 1]} : vector<30x128xbf16> to vector<28x128xbf16>
    %55 = tpu.concatenate %52, %53, %54 in 1 : vector<28x128xbf16>, vector<28x128xbf16>, vector<28x128xbf16> -> vector<28x384xbf16>
    %cst_36 = arith.constant dense<0.000000e+00> : vector<28x128xf32>
    %56 = tpu.matmul %55, %46, %cst_36 {dimension_numbers = #tpu.dot_dimension_numbers<[1], [0], [0], [1], [0, 0, 1, 1], [], []>} : vector<28x384xbf16>, vector<384x128xbf16>, vector<28x128xf32> -> vector<28x128xf32>
    %57 = vector.broadcast %45 : vector<28x1xf32> to vector<28x128xf32>
    %58 = arith.mulf %56, %57 : vector<28x128xf32>
    %cst_37 = arith.constant dense<0.000000e+00> : vector<128xf32>
    %59 = vector.multi_reduction <add>, %58, %cst_37 [0] : vector<28x128xf32> to vector<128xf32>
    %60 = vector.shape_cast %59 : vector<128xf32> to vector<1x128xf32>
    %cst_38 = arith.constant dense<0.000000e+00> : vector<1x8xf32>
    %61 = tpu.matmul %60, %47, %cst_38 {dimension_numbers = #tpu.dot_dimension_numbers<[1], [0], [0], [1], [0, 0, 1, 1], [], []>} : vector<1x128xf32>, vector<128x8xf32>, vector<1x8xf32> -> vector<1x8xf32>
    %cst_39 = arith.constant 0.00347222225 : f32
    %62 = vector.broadcast %cst_39 : f32 to vector<1x8xf32>
    %63 = arith.mulf %61, %62 : vector<1x8xf32>
    %cst_40 = arith.constant dense<0.000000e+00> : vector<1x128xf32>
    %64 = tpu.matmul %63, %48, %cst_40 {dimension_numbers = #tpu.dot_dimension_numbers<[1], [0], [0], [1], [0, 0, 1, 1], [], []>} : vector<1x8xf32>, vector<8x128xf32>, vector<1x128xf32> -> vector<1x128xf32>
    %65 = vector.broadcast %64 : vector<1x128xf32> to vector<28x128xf32>
    %66 = arith.subf %56, %65 : vector<28x128xf32>
    %67 = vector.broadcast %45 : vector<28x1xf32> to vector<28x128xf32>
    %68 = arith.mulf %66, %67 : vector<28x128xf32>
    %69 = arith.mulf %68, %68 : vector<28x128xf32>
    %cst_41 = arith.constant dense<0.000000e+00> : vector<128xf32>
    %70 = vector.multi_reduction <add>, %69, %cst_41 [0] : vector<28x128xf32> to vector<128xf32>
    %71 = vector.shape_cast %70 : vector<128xf32> to vector<1x128xf32>
    %cst_42 = arith.constant dense<0.000000e+00> : vector<1x8xf32>
    %72 = tpu.matmul %71, %47, %cst_42 {dimension_numbers = #tpu.dot_dimension_numbers<[1], [0], [0], [1], [0, 0, 1, 1], [], []>} : vector<1x128xf32>, vector<128x8xf32>, vector<1x8xf32> -> vector<1x8xf32>
    %cst_43 = arith.constant 0.00347222225 : f32
    %73 = vector.broadcast %cst_43 : f32 to vector<1x8xf32>
    %74 = arith.mulf %72, %73 : vector<1x8xf32>
    %cst_44 = arith.constant 9.99999974E-6 : f32
    %75 = vector.broadcast %cst_44 : f32 to vector<1x8xf32>
    %76 = arith.addf %74, %75 : vector<1x8xf32>
    %77 = math.rsqrt %76 : vector<1x8xf32>
    %78 = arith.mulf %49, %77 : vector<1x8xf32>
    %79 = arith.mulf %63, %78 : vector<1x8xf32>
    %80 = arith.subf %50, %79 : vector<1x8xf32>
    %cst_45 = arith.constant dense<0.000000e+00> : vector<1x128xf32>
    %81 = tpu.matmul %78, %48, %cst_45 {dimension_numbers = #tpu.dot_dimension_numbers<[1], [0], [0], [1], [0, 0, 1, 1], [], []>} : vector<1x8xf32>, vector<8x128xf32>, vector<1x128xf32> -> vector<1x128xf32>
    %cst_46 = arith.constant dense<0.000000e+00> : vector<1x128xf32>
    %82 = tpu.matmul %80, %48, %cst_46 {dimension_numbers = #tpu.dot_dimension_numbers<[1], [0], [0], [1], [0, 0, 1, 1], [], []>} : vector<1x8xf32>, vector<8x128xf32>, vector<1x128xf32> -> vector<1x128xf32>
    %83 = vector.broadcast %81 : vector<1x128xf32> to vector<28x128xf32>
    %84 = arith.mulf %56, %83 : vector<28x128xf32>
    %85 = vector.broadcast %82 : vector<1x128xf32> to vector<28x128xf32>
    %86 = arith.addf %84, %85 : vector<28x128xf32>
    %cst_47 = arith.constant 0.000000e+00 : f32
    %87 = vector.broadcast %cst_47 : f32 to vector<28x128xf32>
    %88 = arith.maximumf %86, %87 : vector<28x128xf32>
    %c0_48 = arith.constant 0 : index
    %c0_49 = arith.constant 0 : index
    %89 = vector.load %arg14[%c0_48, %c0_49] : memref<28x128xf32, #tpu.memory_space<vmem>>, vector<28x128xf32>
    tpu.vector_store %arg14[%c0_48, %c0_49], %88 {strides = array<i32>} : memref<28x128xf32, #tpu.memory_space<vmem>>, vector<28x128xf32>,
    return
  }
  func.func @transform_0(%arg0: i32) -> (i32, i32) {
    %c0_i32 = arith.constant 0 : i32
    %c0_i32_0 = arith.constant 0 : i32
    %c0_i32_1 = arith.constant 0 : i32
    return %c0_i32, %c0_i32_0 : i32, i32
  }
  func.func @transform_1(%arg0: i32) -> (i32, i32) {
    %c0_i32 = arith.constant 0 : i32
    %c0_i32_0 = arith.constant 0 : i32
    %c0_i32_1 = arith.constant 0 : i32
    return %c0_i32, %c0_i32_0 : i32, i32
  }
  func.func @transform_2(%arg0: i32) -> (i32, i32) {
    %c0_i32 = arith.constant 0 : i32
    %c0_i32_0 = arith.constant 0 : i32
    %c0_i32_1 = arith.constant 0 : i32
    return %c0_i32, %c0_i32_0 : i32, i32
  }
  func.func @transform_3(%arg0: i32) -> (i32, i32) {
    %c0_i32 = arith.constant 0 : i32
    %c0_i32_0 = arith.constant 0 : i32
    %c0_i32_1 = arith.constant 0 : i32
    return %c0_i32, %c0_i32_0 : i32, i32
  }
  func.func @transform_4(%arg0: i32) -> (i32, i32) {
    %c0_i32 = arith.constant 0 : i32
    %c0_i32_0 = arith.constant 0 : i32
    %c0_i32_1 = arith.constant 0 : i32
    return %c0_i32, %c0_i32_0 : i32, i32
  }
  func.func @transform_5(%arg0: i32) -> (i32, i32) {
    %c0_i32 = arith.constant 0 : i32
    %c0_i32_0 = arith.constant 0 : i32
    %c0_i32_1 = arith.constant 0 : i32
    return %c0_i32, %c0_i32_0 : i32, i32
  }
  func.func @transform_6(%arg0: i32) -> (i32, i32) {
    %c0_i32 = arith.constant 0 : i32
    %c0_i32_0 = arith.constant 0 : i32
    %c0_i32_1 = arith.constant 0 : i32
    return %c0_i32, %c0_i32_0 : i32, i32
  }
  func.func @transform_7(%arg0: i32) -> (i32, i32) {
    %c0_i32 = arith.constant 0 : i32
    %c0_i32_0 = arith.constant 0 : i32
    %c0_i32_1 = arith.constant 0 : i32
    return %c0_i32, %c0_i32_0 : i32, i32
  }
  func.func @transform_8(%arg0: i32) -> (i32, i32) {
    %c0_i32 = arith.constant 0 : i32
    %c0_i32_0 = arith.constant 0 : i32
    %c0_i32_1 = arith.constant 0 : i32
    return %c0_i32, %c0_i32_0 : i32, i32
  }
  func.func @transform_9(%arg0: i32) -> (i32, i32) {
    %c0_i32 = arith.constant 0 : i32
    %c0_i32_0 = arith.constant 0 : i32
    %c0_i32_1 = arith.constant 0 : i32
    return %c0_i32, %c0_i32_0 : i32, i32
  }
  func.func @transform_10(%arg0: i32) -> (i32, i32) {
    %c0_i32 = arith.constant 0 : i32
    %c0_i32_0 = arith.constant 0 : i32
    %c0_i32_1 = arith.constant 0 : i32
    return %c0_i32, %c0_i32_0 : i32, i32
  }
  func.func @transform_11(%arg0: i32) -> (i32, i32) {
    %c0_i32 = arith.constant 0 : i32
    %c0_i32_0 = arith.constant 0 : i32
    %c0_i32_1 = arith.constant 0 : i32
    return %c0_i32, %c0_i32_0 : i32, i32
  }
  func.func @transform_12(%arg0: i32) -> (i32, i32) {
    %c0_i32 = arith.constant 0 : i32
    %c0_i32_0 = arith.constant 0 : i32
    %c0_i32_1 = arith.constant 0 : i32
    return %c0_i32, %c0_i32_0 : i32, i32
  }
  func.func @transform_13(%arg0: i32) -> (i32, i32) {
    %c0_i32 = arith.constant 0 : i32
    %c0_i32_0 = arith.constant 0 : i32
    %c0_i32_1 = arith.constant 0 : i32
    return %c0_i32, %c0_i32_0 : i32, i32
  }
}

</mosaic_0001>

<bundles_post_ra>
// kernel: down_forward.1
= control target key start
LH: loop header
LB: loop body
LE: loop exit
PB: predicated region body
PF: predicated region fallthrough
CT: control target
= control target key end

     0   :  { %18 = vsyncpa [#allocation3], 0  ;;  %s3236_s0 = inlined_call_operand.hbm [shape: f32[32,128], index: 0, kind: input, shape index: {}]   ;;  %s3237_s1 = inlined_call_operand.hbm [shape: f32[30,1], index: 1, kind: input, shape index: {}]   ;;  %s3238_s2 = inlined_call_operand.hbm [shape: f32[28,1], index: 2, kind: input, shape index: {}]   ;;  %s3239_s3 = inlined_call_operand.hbm [shape: bf16[384,128], index: 3, kind: input, shape index: {}]   ;;  %s3240_s4 = inlined_call_operand.hbm [shape: f32[128,8], index: 4, kind: input, shape index: {}]   ;;  %s3241_s5 = inlined_call_operand.hbm [shape: f32[8,128], index: 5, kind: input, shape index: {}]   ;;  %s3242_s6 = inlined_call_operand.hbm [shape: f32[1,8], index: 6, kind: input, shape index: {}, may-alias: {6,11}]   ;;  %s3243_s7 = inlined_call_operand.hbm [shape: f32[1,8], index: 7, kind: input, shape index: {}, may-alias: {7,12}]   ;;  %s3244_s8 = inlined_call_operand.hbm [shape: bf16[384,128], index: 8, kind: input, shape index: {}]   ;;  %s3245_s9 = inlined_call_operand.hbm [shape: f32[128,8], index: 9, kind: input, shape index: {}]   ;;  %s3246_s10 = inlined_call_operand.hbm [shape: f32[8,128], index: 10, kind: input, shape index: {}]   ;;  %s3247_s11 = inlined_call_operand.hbm [shape: f32[1,8], index: 11, kind: input, shape index: {}, may-alias: {6,11}]   ;;  %s3248_s12 = inlined_call_operand.hbm [shape: f32[1,8], index: 12, kind: input, shape index: {}, may-alias: {7,12}]   ;;  %s3249_s13 = inlined_call_operand.hbm [shape: f32[28,128], index: 13, kind: output, shape index: {}]  }
   0x1   :  { %19 = vsyncpa [#allocation6], 0 }
   0x2   :  { %20 = vsyncpa [#allocation9], 0 }
   0x3   :  { %21 = vsyncpa [#allocation12], 0 }
   0x4   :  { %22 = vsyncpa [#allocation15], 0 }
   0x5   :  { %23 = vsyncpa [#allocation18], 0 }
   0x6   :  { %24 = vsyncpa [#allocation21], 0 }
   0x7   :  { %25 = vsyncpa [#allocation4], 0  ;;  %s2732_s25 = smov [#allocation5]   ;;  %s2733_s27 = smov [#allocation8]  }
   0x8   :  { %s43_s26 = sshll.u32 %s2732_s25, 4  ;;  %s67_s28 = sshll.u32 %s2733_s27, 4  ;;  %s44_s26 = int_to_ptr.vmem [resolvable:$true] %s43_s26  ;;  %s2824_s28 = int_to_ptr.vmem [resolvable:$true] %s67_s28 }
   0x9   :  { %s2408_s14 = scalar_lea.hbm %s3237_s1, 512 }
   0xa   :  { %p2409_p0 = scmp.ne.s32.totalorder %s3237_s1, %s2408_s14  ;;  %p2412_p1 = scmp.lt.u32.totalorder %s2408_s14, %s3237_s1 }
   0xc   :  { %p2414_p2 = pnand %p2412_p1, %p2409_p0 }
   0xe   :  { %2417 = shalt.err (!%p2414_p2)
}
   0xf   :  { %s2418_s19 = scalar_lea.vmem %s44_s26, 512  ;;  %p2423_p4 = scmp.lt.s32.totalorder %s44_s26, %s44_s26 }
  0x10   :  { %p2419_p3 = scmp.ne.s32.totalorder %s44_s26, %s2418_s19  ;;  %p2424_p5 = scmp.lt.s32.totalorder %s2418_s19, %s2418_s19 }
  0x12   :  { %p2425_p6 = por %p2424_p5, %p2423_p4 }
  0x14   :  { %p2426_p7 = pnand %p2425_p6, %p2419_p3 }
  0x16   :  { %2429 = shalt.err (!%p2426_p7)
}
  0x17   :  { %s2734_s20 = smov 128   ;;  %s2735_s21 = smov 8  }
  0x18   :  { %49 = dma.hbm_to_vmem [thread:$0]  %s3237_s1, 512, %s44_s26, [#allocation6], %s2734_s20, %s2734_s20, %s2735_s21  }
  0x19   :  { %s2430_s27 = scalar_lea.hbm %s3239_s3, 3072 }
  0x1a   :  { %p2431_p8 = scmp.ne.s32.totalorder %s3239_s3, %s2430_s27  ;;  %p2434_p9 = scmp.lt.u32.totalorder %s2430_s27, %s3239_s3 }
  0x1c   :  { %p2436_p10 = pnand %p2434_p9, %p2431_p8 }
  0x1e   :  { %2439 = shalt.err (!%p2436_p10)
}
  0x1f   :  { %s2440_s16 = scalar_lea.vmem %s2824_s28, 3072  ;;  %p2445_p12 = scmp.lt.s32.totalorder %s2824_s28, %s2824_s28 }
  0x20   :  { %p2441_p11 = scmp.ne.s32.totalorder %s2824_s28, %s2440_s16  ;;  %p2446_p13 = scmp.lt.s32.totalorder %s2440_s16, %s2440_s16 }
  0x22   :  { %p2447_p0 = por %p2446_p13, %p2445_p12 }
  0x24   :  { %p2448_p1 = pnand %p2447_p0, %p2441_p11 }
  0x26   :  { %2451 = shalt.err (!%p2448_p1)
}
  0x27   :  { %s2736_s1 = smov 64   ;;  %s2737_s26 = smov 4  }
  0x28   :  { %73 = dma.hbm_to_vmem [thread:$0]  %s3239_s3, 3072, %s2824_s28, [#allocation9], %s2736_s1, %s2736_s1, %s2737_s26  }
  0x29   :  { %s2738_s19 = smov [#allocation11]   ;;  %s2739_s23 = smov [#allocation14]  }
  0x2a   :  { %s92_s22 = sshll.u32 %s2738_s19, 4  ;;  %s112_s24 = sshll.u32 %s2739_s23, 4  ;;  %s93_s22 = int_to_ptr.vmem [resolvable:$true] %s92_s22  ;;  %s113_s24 = int_to_ptr.vmem [resolvable:$true] %s112_s24 }
  0x2b   :  { %s2452_s29 = scalar_lea.hbm %s3241_s5, 128 }
  0x2c   :  { %p2453_p2 = scmp.ne.s32.totalorder %s3241_s5, %s2452_s29  ;;  %p2456_p3 = scmp.lt.u32.totalorder %s2452_s29, %s3241_s5 }
  0x2e   :  { %p2458_p4 = pnand %p2456_p3, %p2453_p2 }
  0x30   :  { %2461 = shalt.err (!%p2458_p4)
}
  0x31   :  { %s2462_s3 = scalar_lea.vmem %s93_s22, 128  ;;  %p2467_p6 = scmp.lt.s32.totalorder %s93_s22, %s93_s22 }
  0x32   :  { %p2463_p5 = scmp.ne.s32.totalorder %s93_s22, %s2462_s3  ;;  %p2468_p7 = scmp.lt.s32.totalorder %s2462_s3, %s2462_s3 }
  0x34   :  { %p2469_p8 = por %p2468_p7, %p2467_p6 }
  0x36   :  { %p2470_p9 = pnand %p2469_p8, %p2463_p5 }
  0x38   :  { %2473 = shalt.err (!%p2470_p9)
}
  0x39   :  { %95 = dma.hbm_to_vmem [thread:$0]  %s3241_s5, 128, %s93_s22, [#allocation12]  }
  0x3a   :  { %s2474_s23 = scalar_lea.hbm %s3243_s7, 16 }
  0x3b   :  { %p2475_p10 = scmp.ne.s32.totalorder %s3243_s7, %s2474_s23  ;;  %p2478_p11 = scmp.lt.u32.totalorder %s2474_s23, %s3243_s7 }
  0x3d   :  { %p2480_p12 = pnand %p2478_p11, %p2475_p10 }
  0x3f   :  { %2483 = shalt.err (!%p2480_p12)
}
  0x40   :  { %s2484_s14 = scalar_lea.vmem %s113_s24, 16  ;;  %s2488_s15 = scalar_lea.vmem %s113_s24, 32 }
  0x41   :  { %p2485_p13 = scmp.ne.s32.totalorder %s113_s24, %s2484_s14  ;;  %p2489_p0 = scmp.lt.s32.totalorder %s113_s24, %s113_s24 }
  0x42   :  { %p2490_p1 = scmp.lt.s32.totalorder %s2488_s15, %s2484_s14 }
  0x44   :  { %p2491_p2 = por %p2490_p1, %p2489_p0 }
  0x46   :  { %p2492_p3 = pnand %p2491_p2, %p2485_p13 }
  0x48   :  { %2495 = shalt.err (!%p2492_p3)
}
  0x49   :  { %115 = dma.hbm_to_vmem [thread:$0]  %s3243_s7, 16, %s113_s24, [#allocation15]  }
  0x4a   :  { %s2740_s16 = smov [#allocation17]   ;;  %s2741_s28 = smov [#allocation20]  }
  0x4b   :  { %s133_s3 = sshll.u32 %s2740_s16, 4  ;;  %s156_s17 = sshll.u32 %s2741_s28, 4  ;;  %s134_s3 = int_to_ptr.vmem [resolvable:$true] %s133_s3  ;;  %s157_s17 = int_to_ptr.vmem [resolvable:$true] %s156_s17 }
  0x4c   :  { %s2496_s23 = scalar_lea.hbm %s3245_s9, 2048 }
  0x4d   :  { %p2497_p4 = scmp.ne.s32.totalorder %s3245_s9, %s2496_s23  ;;  %p2500_p5 = scmp.lt.u32.totalorder %s2496_s23, %s3245_s9 }
  0x4f   :  { %p2502_p6 = pnand %p2500_p5, %p2497_p4 }
  0x51   :  { %2505 = shalt.err (!%p2502_p6)
}
  0x52   :  { %s2506_s7 = scalar_lea.vmem %s134_s3, 2048  ;;  %p2511_p8 = scmp.lt.s32.totalorder %s134_s3, %s134_s3 }
  0x53   :  { %p2507_p7 = scmp.ne.s32.totalorder %s134_s3, %s2506_s7  ;;  %p2512_p9 = scmp.lt.s32.totalorder %s2506_s7, %s2506_s7 }
  0x55   :  { %p2513_p10 = por %p2512_p9, %p2511_p8 }
  0x57   :  { %p2514_p11 = pnand %p2513_p10, %p2507_p7 }
  0x59   :  { %2517 = shalt.err (!%p2514_p11)
}
  0x5a   :  { %139 = dma.hbm_to_vmem [thread:$0]  %s3245_s9, 2048, %s134_s3, [#allocation18], %s2734_s20, %s2734_s20, %s2735_s21  }
  0x5b   :  { %s2518_s22 = scalar_lea.hbm %s3247_s11, 16 }
  0x5c   :  { %p2519_p12 = scmp.ne.s32.totalorder %s3247_s11, %s2518_s22  ;;  %p2522_p13 = scmp.lt.u32.totalorder %s2518_s22, %s3247_s11 }
  0x5e   :  { %p2524_p0 = pnand %p2522_p13, %p2519_p12 }
  0x60   :  { %2527 = shalt.err (!%p2524_p0)
}
  0x61   :  { %s2528_s23 = scalar_lea.vmem %s157_s17, 16  ;;  %s2532_s25 = scalar_lea.vmem %s157_s17, 32 }
  0x62   :  { %p2529_p1 = scmp.ne.s32.totalorder %s157_s17, %s2528_s23  ;;  %p2533_p2 = scmp.lt.s32.totalorder %s157_s17, %s157_s17 }
  0x63   :  { %p2534_p3 = scmp.lt.s32.totalorder %s2532_s25, %s2528_s23 }
  0x65   :  { %p2535_p4 = por %p2534_p3, %p2533_p2 }
  0x67   :  { %p2536_p5 = pnand %p2535_p4, %p2529_p1 }
  0x69   :  { %2539 = shalt.err (!%p2536_p5)
}
  0x6a   :  { %159 = dma.hbm_to_vmem [thread:$0]  %s3247_s11, 16, %s157_s17, [#allocation21]  }
  0x6b   :  { %s2742_s27 = smov [#allocation2]   ;;  %s2743_s30 = smov [#allocation7]  }
  0x6c   :  { %s31_s29 = sshll.u32 %s2742_s27, 4  ;;  %s55_s7 = sshll.u32 %s2743_s30, 4  ;;  %s32_s29 = int_to_ptr.vmem [resolvable:$true] %s31_s29  ;;  %s2912_s7 = int_to_ptr.vmem [resolvable:$true] %s55_s7 }
  0x6d   :  { %s2540_s15 = scalar_lea.hbm %s3236_s0, 512 }
  0x6e   :  { %p2541_p6 = scmp.ne.s32.totalorder %s3236_s0, %s2540_s15  ;;  %p2544_p7 = scmp.lt.u32.totalorder %s2540_s15, %s3236_s0 }
  0x70   :  { %p2546_p8 = pnand %p2544_p7, %p2541_p6 }
  0x72   :  { %2549 = shalt.err (!%p2546_p8)
}
  0x73   :  { %s2550_s11 = scalar_lea.vmem %s32_s29, 512  ;;  %p2555_p10 = scmp.lt.s32.totalorder %s32_s29, %s32_s29 }
  0x74   :  { %p2551_p9 = scmp.ne.s32.totalorder %s32_s29, %s2550_s11  ;;  %p2556_p11 = scmp.lt.s32.totalorder %s2550_s11, %s2550_s11 }
  0x76   :  { %p2557_p12 = por %p2556_p11, %p2555_p10 }
  0x78   :  { %p2558_p13 = pnand %p2557_p12, %p2551_p9 }
  0x7a   :  { %2561 = shalt.err (!%p2558_p13)
}
  0x7b   :  { %37 = dma.hbm_to_vmem [thread:$0]  %s3236_s0, 512, %s32_s29, [#allocation3], %s2734_s20, %s2734_s20, %s2735_s21  }
  0x7c   :  { %s2562_s25 = scalar_lea.hbm %s3238_s2, 512 }
  0x7d   :  { %p2563_p0 = scmp.ne.s32.totalorder %s3238_s2, %s2562_s25  ;;  %p2566_p1 = scmp.lt.u32.totalorder %s2562_s25, %s3238_s2 }
  0x7f   :  { %p2568_p2 = pnand %p2566_p1, %p2563_p0 }
  0x81   :  { %2571 = shalt.err (!%p2568_p2)
}
  0x82   :  { %s2572_s24 = scalar_lea.vmem %s2912_s7, 512  ;;  %p2577_p4 = scmp.lt.s32.totalorder %s2912_s7, %s2912_s7 }
  0x83   :  { %p2573_p3 = scmp.ne.s32.totalorder %s2912_s7, %s2572_s24  ;;  %p2578_p5 = scmp.lt.s32.totalorder %s2572_s24, %s2572_s24 }
  0x85   :  { %p2579_p6 = por %p2578_p5, %p2577_p4 }
  0x87   :  { %p2580_p7 = pnand %p2579_p6, %p2573_p3 }
  0x89   :  { %2583 = shalt.err (!%p2580_p7)
}
  0x8a   :  { %61 = dma.hbm_to_vmem [thread:$0]  %s3238_s2, 512, %s2912_s7, [#allocation6], %s2734_s20, %s2734_s20, %s2735_s21  }
  0x8b   :  { %s2744_s14 = smov [#allocation10]   ;;  %s2745_s5 = smov [#allocation13]  }
  0x8c   :  { %s79_s15 = sshll.u32 %s2744_s14, 4  ;;  %s102_s22 = sshll.u32 %s2745_s5, 4  ;;  %s80_s15 = int_to_ptr.vmem [resolvable:$true] %s79_s15  ;;  %s103_s22 = int_to_ptr.vmem [resolvable:$true] %s102_s22 }
  0x8d   :  { %s2584_s11 = scalar_lea.hbm %s3240_s4, 2048 }
  0x8e   :  { %p2585_p8 = scmp.ne.s32.totalorder %s3240_s4, %s2584_s11  ;;  %p2588_p9 = scmp.lt.u32.totalorder %s2584_s11, %s3240_s4 }
  0x90   :  { %p2590_p10 = pnand %p2588_p9, %p2585_p8 }
  0x92   :  { %2593 = shalt.err (!%p2590_p10)
}
  0x93   :  { %s2594_s2 = scalar_lea.vmem %s80_s15, 2048  ;;  %p2599_p12 = scmp.lt.s32.totalorder %s80_s15, %s80_s15 }
  0x94   :  { %p2595_p11 = scmp.ne.s32.totalorder %s80_s15, %s2594_s2  ;;  %p2600_p13 = scmp.lt.s32.totalorder %s2594_s2, %s2594_s2 }
  0x96   :  { %p2601_p0 = por %p2600_p13, %p2599_p12 }
  0x98   :  { %p2602_p1 = pnand %p2601_p0, %p2595_p11 }
  0x9a   :  { %2605 = shalt.err (!%p2602_p1)
}
  0x9b   :  { %85 = dma.hbm_to_vmem [thread:$0]  %s3240_s4, 2048, %s80_s15, [#allocation9], %s2734_s20, %s2734_s20, %s2735_s21  }
  0x9c   :  { %s2606_s27 = scalar_lea.hbm %s3242_s6, 16 }
  0x9d   :  { %p2607_p2 = scmp.ne.s32.totalorder %s3242_s6, %s2606_s27  ;;  %p2610_p3 = scmp.lt.u32.totalorder %s2606_s27, %s3242_s6 }
  0x9f   :  { %p2612_p4 = pnand %p2610_p3, %p2607_p2 }
  0xa1   :  { %2615 = shalt.err (!%p2612_p4)
}
  0xa2   :  { %s2616_s14 = scalar_lea.vmem %s103_s22, 16  ;;  %s2620_s5 = scalar_lea.vmem %s103_s22, 32 }
  0xa3   :  { %p2617_p5 = scmp.ne.s32.totalorder %s103_s22, %s2616_s14  ;;  %p2621_p6 = scmp.lt.s32.totalorder %s103_s22, %s103_s22 }
  0xa4   :  { %p2622_p7 = scmp.lt.s32.totalorder %s2620_s5, %s2616_s14 }
  0xa6   :  { %p2623_p8 = por %p2622_p7, %p2621_p6 }
  0xa8   :  { %p2624_p9 = pnand %p2623_p8, %p2617_p5 }
  0xaa   :  { %2627 = shalt.err (!%p2624_p9)
}
  0xab   :  { %105 = dma.hbm_to_vmem [thread:$0]  %s3242_s6, 16, %s103_s22, [#allocation12]  }
  0xac   :  { %s2746_s16 = smov [#allocation16]   ;;  %s2747_s11 = smov [#allocation19]  }
  0xad   :  { %s121_s28 = sshll.u32 %s2746_s16, 4  ;;  %s146_s17 = sshll.u32 %s2747_s11, 4  ;;  %s122_s28 = int_to_ptr.vmem [resolvable:$true] %s121_s28  ;;  %s147_s17 = int_to_ptr.vmem [resolvable:$true] %s146_s17 }
  0xae   :  { %s2628_s23 = scalar_lea.hbm %s3244_s8, 3072 }
  0xaf   :  { %p2629_p10 = scmp.ne.s32.totalorder %s3244_s8, %s2628_s23  ;;  %p2632_p11 = scmp.lt.u32.totalorder %s2628_s23, %s3244_s8 }
  0xb1   :  { %p2634_p12 = pnand %p2632_p11, %p2629_p10 }
  0xb3   :  { %2637 = shalt.err (!%p2634_p12)
}
  0xb4   :  { %s2638_s6 = scalar_lea.vmem %s122_s28, 3072  ;;  %p2643_p0 = scmp.lt.s32.totalorder %s122_s28, %s122_s28 }
  0xb5   :  { %p2639_p13 = scmp.ne.s32.totalorder %s122_s28, %s2638_s6  ;;  %p2644_p1 = scmp.lt.s32.totalorder %s2638_s6, %s2638_s6 }
  0xb7   :  { %p2645_p2 = por %p2644_p1, %p2643_p0 }
  0xb9   :  { %p2646_p3 = pnand %p2645_p2, %p2639_p13 }
  0xbb   :  { %2649 = shalt.err (!%p2646_p3)
}
  0xbc   :  { %127 = dma.hbm_to_vmem [thread:$0]  %s3244_s8, 3072, %s122_s28, [#allocation15], %s2736_s1, %s2736_s1, %s2737_s26  }
  0xbd   :  { %s2650_s24 = scalar_lea.hbm %s3246_s10, 128 }
  0xbe   :  { %p2651_p4 = scmp.ne.s32.totalorder %s3246_s10, %s2650_s24  ;;  %p2654_p5 = scmp.lt.u32.totalorder %s2650_s24, %s3246_s10 }
  0xc0   :  { %p2656_p6 = pnand %p2654_p5, %p2651_p4 }
  0xc2   :  { %2659 = shalt.err (!%p2656_p6)
}
  0xc3   :  { %s2660_s4 = scalar_lea.vmem %s147_s17, 128  ;;  %p2665_p8 = scmp.lt.s32.totalorder %s147_s17, %s147_s17 }
  0xc4   :  { %p2661_p7 = scmp.ne.s32.totalorder %s147_s17, %s2660_s4  ;;  %p2666_p9 = scmp.lt.s32.totalorder %s2660_s4, %s2660_s4 }
  0xc6   :  { %p2667_p10 = por %p2666_p9, %p2665_p8 }
  0xc8   :  { %p2668_p11 = pnand %p2667_p10, %p2661_p7 }
  0xca   :  { %2671 = shalt.err (!%p2668_p11)
}
  0xcb   :  { %149 = dma.hbm_to_vmem [thread:$0]  %s3246_s10, 128, %s147_s17, [#allocation18]  }
  0xcc   :  { %s2748_s26 = smov [#allocation22]   ;;  %s2672_s11 = scalar_lea.hbm %s3248_s12, 16 }
  0xcd   :  { %s166_s15 = sshll.u32 %s2748_s26, 4  ;;  %p2673_p12 = scmp.ne.s32.totalorder %s3248_s12, %s2672_s11  ;;  %s167_s15 = int_to_ptr.vmem [resolvable:$true] %s166_s15 }
  0xce   :  { %p2676_p13 = scmp.lt.u32.totalorder %s2672_s11, %s3248_s12 }
  0xd0   :  { %p2678_p0 = pnand %p2676_p13, %p2673_p12 }
  0xd2   :  { %2681 = shalt.err (!%p2678_p0)
}
  0xd3   :  { %s2682_s7 = scalar_lea.vmem %s167_s15, 16  ;;  %s2686_s10 = scalar_lea.vmem %s167_s15, 32 }
  0xd4   :  { %p2683_p1 = scmp.ne.s32.totalorder %s167_s15, %s2682_s7  ;;  %p2687_p2 = scmp.lt.s32.totalorder %s167_s15, %s167_s15 }
  0xd5   :  { %p2688_p3 = scmp.lt.s32.totalorder %s2686_s10, %s2682_s7 }
  0xd7   :  { %p2689_p4 = por %p2688_p3, %p2687_p2 }
  0xd9   :  { %p2690_p5 = pnand %p2689_p4, %p2683_p1 }
  0xdb   :  { %2693 = shalt.err (!%p2690_p5)
}
  0xdc   :  { %169 = dma.hbm_to_vmem [thread:$0]  %s3248_s12, 16, %s167_s15, [#allocation21]  }
  0xdd   :  { %2716 = dma.done.wait [#allocation3], 512  }
  0xde   :  { %2717 = vsyncadd [#allocation3], 4294966784 }
  0xdf   :  { %2718 = dma.done.wait [#allocation6], 1024  }
  0xe0   :  { %2719 = vsyncadd [#allocation6], 4294966272 }
  0xe1   :  { %2720 = dma.done.wait [#allocation9], 5120  }
  0xe2   :  { %2721 = vsyncadd [#allocation9], 4294962176 }
  0xe3   :  { %2722 = dma.done.wait [#allocation12], 144  }
  0xe4   :  { %2723 = vsyncadd [#allocation12], 4294967152 }
  0xe5   :  { %2724 = dma.done.wait [#allocation15], 3088  }
  0xe6   :  { %2725 = vsyncadd [#allocation15], 4294964208 }
  0xe7   :  { %2726 = dma.done.wait [#allocation18], 2176  }
  0xe8   :  { %2727 = vsyncadd [#allocation18], 4294965120 }
  0xe9   :  { %2728 = dma.done.wait [#allocation21], 32  }
  0xea   :  { %2729 = vsyncadd [#allocation21], 4294967264  ;;  %v2749_v0 = vmov 0   ;;  %v2356_v1 = vld [vmem:[#allocation8 + $0x40] sm:$0xff]   ;;  %v2359_v4 = vld [vmem:[#allocation8 + $0x48] sm:$0xff]   ;;  %vm307_vm1 = vcmask 1046528  }
  0xeb   :  { %2354 = vset.pattern.permute.xlu0 %v2749_v0  ;;  %2355 = vset.pattern.permute.xlu1 %v2749_v0  ;;  %v2357_v2 = vld [vmem:[#allocation8] sm:$0xff]   ;;  %v2360_v5 = vld [vmem:[#allocation8 + $0x8] sm:$0xff]   ;;  %v2362_v7 = vld [vmem:[#allocation8 + $0x50] sm:$0xff]   ;;  %vm287_vm0 = vsmask.f32 7424  ;;  %v2750_v54 = vmov 0.0|0.0  }
  0xec   :  { %1870 = vmatprep.subr.bf16.mxu0 %v2356_v1  ;;  %v2358_v3 = vld [vmem:[#allocation8 + $0x80] sm:$0xff]   ;;  %v2361_v6 = vld [vmem:[#allocation8 + $0x88] sm:$0xff]   ;;  %v2363_v8 = vld [vmem:[#allocation8 + $0x10] sm:$0xff]   ;;  %vm2751_vm2 = vmmov 0   ;;  %vm581_vm3 = vcmask 1045504   ;;  %vm661_vm4 = vcmask 64512  }
  0xed   :  { %1871 = vmatpush3.bf16.msra.mxu0 %v2357_v2  ;;  %2026 = vmatprep.subr.bf16.mxu1 %v2358_v3  ;;  %v2364_v9 = vld [vmem:[#allocation8 + $0x90] sm:$0xff]   ;;  %v2365_v10 = vld [vmem:[#allocation8 + $0x58] sm:$0xff]   ;;  %v2368_v13 = vld [vmem:[#allocation8 + $0x60] sm:$0xff]   ;;  %vm1368_vm5 = vcmask 1043456   ;;  %s2753_s12 = smov [#allocation23]  }
  0xee   :  { %2027 = vmatpush3.bf16.msra.mxu1 %v2358_v3  ;;  %1872 = vmatprep.subr.bf16.mxu0 %v2359_v4  ;;  %v2366_v11 = vld [vmem:[#allocation8 + $0x18] sm:$0xff]   ;;  %v2370_v14 = vld [vmem:[#allocation8 + $0xa0] sm:$0xff]   ;;  %v2371_v16 = vld [vmem:[#allocation8 + $0x68] sm:$0xff]   ;;  %s1798_s9 = sshll.u32 %s2753_s12, 4  ;;  %s1799_s9 = int_to_ptr.vmem [resolvable:$true] %s1798_s9 }
  0xef   :  { %2028 = vmatprep.subr.bf16.mxu1 %v2361_v6  ;;  %v2367_v12 = vld [vmem:[#allocation8 + $0x98] sm:$0xff]   ;;  %v2369_v15 = vld [vmem:[#allocation8 + $0x20] sm:$0xff]   ;;  %v2373_v17 = vld [vmem:[#allocation8 + $0xa8] sm:$0xff]   ;;  %s2694_s6 = scalar_lea.vmem %s1799_s9, 512  ;;  %p2699_p7 = scmp.lt.s32.totalorder %s1799_s9, %s1799_s9 }
  0xf0   :  { %v2372_v18 = vld [vmem:[#allocation8 + $0x28] sm:$0xff]   ;;  %v2374_v19 = vld [vmem:[#allocation8 + $0x70] sm:$0xff]   ;;  %v2377_v22 = vld [vmem:[#allocation8 + $0x78] sm:$0xff]   ;;  %p2695_p6 = scmp.ne.s32.totalorder %s1799_s9, %s2694_s6  ;;  %p2700_p8 = scmp.lt.s32.totalorder %s2694_s6, %s2694_s6 }
  0xf1   :  { %1873 = vmatpush3.bf16.msra.mxu0 %v2360_v5  ;;  %v2375_v20 = vld [vmem:[#allocation8 + $0x30] sm:$0xff]   ;;  %v210_v23 = vld [vmem:[#allocation2] sm:$0xff]  ;;  %v211_v24 = vld [vmem:[#allocation2 + $0x8] sm:$0xff] }
  0xf2   :  { %1874 = vmatprep.subr.bf16.mxu0 %v2362_v7  ;;  %2029 = vmatpush3.bf16.msra.mxu1 %v2361_v6  ;;  %v2376_v21 = vld [vmem:[#allocation8 + $0xb0] sm:$0xff]   ;;  %v213_v26 = vld [vmem:[#allocation2 + $0x18] sm:$0xff]  ;;  %v285_v27 = vpack.c.bf16 %v211_v24, %v210_v23  ;;  %v214_v28 = vld [vmem:[#allocation5] sm:$0xff]  ;;  %p2701_p9 = por %p2700_p8, %p2699_p7 }
  0xf3   :  { %2030 = vmatprep.subr.bf16.mxu1 %v2364_v9  ;;  %v212_v25 = vld [vmem:[#allocation2 + $0x10] sm:$0xff]  ;;  %v2379_v30 = vld [vmem:[#allocation8 + $0xb8] sm:$0xff]   ;;  %557 = vperm.xlu0 %2354, %v214_v28   ;;  %v215_v36 = vld [vmem:[#allocation5 + $0x8] sm:$0xff] }
  0xf4   :  { %v216_v29 = vld [vmem:[#allocation5 + $0x10] sm:$0xff]  ;;  %v286_v31 = vpack.c.bf16 %v213_v26, %v212_v25  ;;  %v2378_v32 = vld [vmem:[#allocation8 + $0x38] sm:$0xff]   ;;  %v289_v33 = vshrl.u32 %v285_v27, 16  ;;  %v291_v34 = vshll.u32 %v285_v27, 16  ;;  %v308_v35 = vrot.slane %v285_v27, 1  ;;  %v1003_v44 = vld [vmem:[#allocation7] sm:$0xff]  ;;  %p2702_p10 = pnand %p2701_p9, %p2695_p6 }
  0xf5   :  { %1875 = vmatpush3.bf16.msra.mxu0 %v2363_v8  ;;  %567 = vperm.xlu1 %2355, %v216_v29   ;;  %v217_v40 = vld [vmem:[#allocation5 + $0x18] sm:$0x3f]  ;;  %v1004_v47 = vld [vmem:[#allocation7 + $0x8] sm:$0xff]  ;;  %v1005_v49 = vld [vmem:[#allocation7 + $0x10] sm:$0xff] }
  0xf6   :  { %1876 = vmatprep.subr.bf16.mxu0 %v2365_v10  ;;  %2031 = vmatpush3.bf16.msra.mxu1 %v2364_v9  ;;  %v296_v37 = vshll.u32 %v286_v31, 16  ;;  %v309_v38 = vrot.slane %v286_v31, 1  ;;  %v300_v39 = vshrl.u32 %v286_v31, 16  ;;  %v293_v41 = vrot.slane %v291_v34, 1  ;;  %v1006_v50 = vld [vmem:[#allocation7 + $0x18] sm:$0xf] }
  0xf7   :  { %2032 = vmatprep.subr.bf16.mxu1 %v2367_v12  ;;  %562 = vperm.xlu0 %2354, %v215_v36   ;;  %v266_v51 = vld [vmem:[#allocation10] sm:$0xff]  ;;  %v267_v52 = vld [vmem:[#allocation10 + $0x8] sm:$0xff]  ;;  %v268_v55 = vld [vmem:[#allocation10 + $0x10] sm:$0xff] }
  0xf8   :  { %v298_v42 = vrot.slane %v296_v37, 1  ;;  %v310_v43 = vsel %vm307_vm1, %v308_v35, %v309_v38  ;;  %v294_v45 = vor.u32 %v293_v41, %v289_v33  ;;  %v3017_v53 = vpack.c.bf16 %v267_v52, %v266_v51  ;;  %v269_v56 = vld [vmem:[#allocation10 + $0x18] sm:$0xff]  ;;  %v270_v58 = vld [vmem:[#allocation10 + $0x20] sm:$0xff]  ;;  %v271_v59 = vld [vmem:[#allocation10 + $0x28] sm:$0xff] }
  0xf9   :  { %1877 = vmatpush3.bf16.msra.mxu0 %v2366_v11  ;;  %2042 = vmatprep.mubr.bf16.mxu1 %v310_v43  ;;  %v3022_v57 = vpack.c.bf16 %v269_v56, %v268_v55  ;;  %v3026_v60 = vpack.c.bf16 %v271_v59, %v270_v58  ;;  %v272_v61 = vld [vmem:[#allocation10 + $0x30] sm:$0xff]  ;;  %v273_v62 = vld [vmem:[#allocation10 + $0x38] sm:$0xff]  ;;  %v274_v0 = vld [vmem:[#allocation10 + $0x40] sm:$0xff] }
  0xfa   :  { %1878 = vmatprep.subr.bf16.mxu0 %v2368_v13  ;;  %2033 = vmatpush3.bf16.msra.mxu1 %v2367_v12  ;;  %v302_v46 = vor.u32 %v300_v39, %v298_v42  ;;  %v299_v48 = vsel %vm287_vm0, %v294_v45, %v298_v42  ;;  %v3030_v63 = vpack.c.bf16 %v273_v62, %v272_v61  ;;  %v275_v1 = vld [vmem:[#allocation10 + $0x48] sm:$0xff]  ;;  %v276_v3 = vld [vmem:[#allocation10 + $0x50] sm:$0xff]  ;;  %v277_v4 = vld [vmem:[#allocation10 + $0x58] sm:$0xff]  ;;  %v2752_v12 = vmov 0.0  }
  0xfb   :  { %2034 = vmatprep.subr.bf16.mxu1 %v2370_v14  ;;  %572 = vperm.xlu1 %2355, %v217_v40   ;;  %v3034_v2 = vpack.c.bf16 %v275_v1, %v274_v0  ;;  %v3038_v5 = vpack.c.bf16 %v277_v4, %v276_v3  ;;  %v278_v6 = vld [vmem:[#allocation10 + $0x60] sm:$0xff]  ;;  %v279_v7 = vld [vmem:[#allocation10 + $0x68] sm:$0xff]  ;;  %v280_v9 = vld [vmem:[#allocation10 + $0x70] sm:$0xff] }
  0xfc   :  { %489 = vmatprep.mubr.bf16.mxu0 %v299_v48  ;;  %1344 = vperm.xlu0 %2354, %v1003_v44   ;;  %v3042_v8 = vpack.c.bf16 %v279_v7, %v278_v6  ;;  %v281_v10 = vld [vmem:[#allocation10 + $0x78] sm:$0xff]  ;;  %v3055_v13 = vld [vmem:[#allocation11] sm:$0xff] }
  0xfd   :  { %1879 = vmatpush3.bf16.msra.mxu0 %v2369_v15  ;;  %v3045_v11 = vpack.c.bf16 %v281_v10, %v280_v9 }
  0xfe   :  { %1880 = vmatprep.subr.bf16.mxu0 %v2371_v16  ;;  %2035 = vmatpush3.bf16.msra.mxu1 %v2370_v14 }
  0xff   :  { %2036 = vmatprep.subr.bf16.mxu1 %v2373_v17  ;;  %1349 = vperm.xlu1 %2355, %v1004_v47  }
 0x100   :  { %1354 = vperm.xlu0 %2354, %v1005_v49  }
 0x101   :  { %1881 = vmatpush3.bf16.msra.mxu0 %v2372_v18 }
 0x102   :  { %1882 = vmatprep.subr.bf16.mxu0 %v2374_v19  ;;  %2037 = vmatpush3.bf16.msra.mxu1 %v2373_v17 }
 0x103   :  { %2038 = vmatprep.subr.bf16.mxu1 %v2376_v21  ;;  %1359 = vperm.xlu1 %2355, %v1006_v50  }
 0x105   :  { %1883 = vmatpush3.bf16.msra.mxu0 %v2375_v20 }
 0x106   :  { %1884 = vmatprep.subr.bf16.mxu0 %v2377_v22  ;;  %2039 = vmatpush3.bf16.msra.mxu1 %v2376_v21 }
 0x107   :  { %2040 = vmatprep.subr.bf16.mxu1 %v2379_v30 }
 0x109   :  { %1885 = vmatpush3.bf16.msra.mxu0 %v2378_v32 }
 0x10a   :  { %2041 = vmatpush3.bf16.msra.mxu1 %v2379_v30  ;;  %2236 = vmatprep.subr.bf16.mxu0 %v2750_v54 }
 0x10b   :  { %2081 = vmatprep.subr.mxu1 %v2752_v12 }
 0x10c   :  { %490 = vmatmul.mubr.bf16.vlgmr.msra.gmra.mrb[0].mxu0 %v285_v27 }
 0x10d   :  { %2043 = vmatmul.mubr.bf16.vlgmr.msra.gmra.mrb[0].mxu1 %v309_v38  ;;  %497 = vmatprep.mubr.bf16.mxu0 %v302_v46 }
 0x10e   :  { %2238 = vmatpush3.bf16.msra.mxu0 %v3017_v53  ;;  %2083 = vmatprep.mubr.msk.f32.mxu1 %vm2751_vm2, %v2752_v12 }
 0x10f   :  { %2239 = vmatprep.subr.bf16.mxu0 %v2750_v54  ;;  %2082 = vmatpush3.msra.mxu1 %v3055_v13 }
 0x110   :  { %2260 = vmatprep.subr.bf16.mxu1 %v2750_v54 }
 0x112   :  { %2241 = vmatpush3.bf16.msra.mxu0 %v3022_v57 }
 0x113   :  { %2242 = vmatprep.subr.bf16.mxu0 %v2750_v54 }
 0x114   :  { %498 = vmatmul.mubr.bf16.gmra.mrb[4].mxu0 %v286_v31 }
 0x115   :  { %2078 = vmatprep.mubr.msk.f32.mxu0 %vm2751_vm2, %v2752_v12 }
 0x116   :  { %2244 = vmatpush3.bf16.msra.mxu0 %v3026_v60 }
 0x117   :  { %2245 = vmatprep.subr.bf16.mxu0 %v2750_v54 }
 0x11a   :  { %2247 = vmatpush3.bf16.msra.mxu0 %v3030_v63 }
 0x11b   :  { %2248 = vmatprep.subr.bf16.mxu0 %v2750_v54 }
 0x11e   :  { %2250 = vmatpush3.bf16.msra.mxu0 %v3034_v2 }
 0x11f   :  { %2251 = vmatprep.subr.bf16.mxu0 %v2750_v54 }
 0x122   :  { %2253 = vmatpush3.bf16.msra.mxu0 %v3038_v5 }
 0x123   :  { %2254 = vmatprep.subr.bf16.mxu0 %v2750_v54 }
 0x126   :  { %2256 = vmatpush3.bf16.msra.mxu0 %v3042_v8 }
 0x127   :  { %2257 = vmatprep.subr.bf16.mxu0 %v2750_v54 }
 0x12a   :  { %2259 = vmatpush3.bf16.msra.mxu0 %v3045_v11 }
 0x12b   :  { %2121 = vmatprep.subr.mxu0 %v2752_v12 }
 0x172   :  { %v3059_v14 = vpop.permute.xlu0 %557 }
 0x174   :  { %v3065_v27 = vpop.permute.xlu1 %567 }
 0x176   :  { %v563_v29 = vpop.permute.xlu0 %562 }
 0x17a   :  { %v573_v41 = vpop.permute.xlu1 %572 }
 0x1df   :  { %v1886_v15 = vpop.f32.mrb[0].mxu0 }
 0x1e0   :  { %v1887_v16 = vpop.f32.mrb[1].mxu0  ;;  %v2044_v17 = vpop.f32.mrb[0].mxu1 }
 0x1e1   :  { %v1888_v18 = vadd.f32 %v1887_v16, %v1886_v15  ;;  %v1889_v19 = vpop.f32.mrb[2].mxu0  ;;  %v540_v20 = vpop.f32.mrb[1].mxu1 }
 0x1e2   :  { %v1890_v21 = vpop.f32.mrb[3].mxu0  ;;  %v2045_v22 = vpop.f32.mrb[2].mxu1 }
 0x1e3   :  { %v1891_v23 = vadd.f32 %v1890_v21, %v1889_v19  ;;  %v3061_v24 = vadd.f32 %v1888_v18, %v540_v20  ;;  %v543_v25 = vpop.f32.mrb[3].mxu1 }
 0x1e5   :  { %v3063_v26 = vadd.f32 %v1891_v23, %v543_v25  ;;  %v575_v35 = vmul.f32 %v3059_v14, %v3061_v24  ;;  %v2382_v23 = vld [vmem:[#allocation16 + $0x88] sm:$0xff]   ;;  %v2385_v25 = vld [vmem:[#allocation16 + $0x90] sm:$0xff]  }
 0x1e7   :  { %v1892_v28 = vpop.f32.mrb[4].mxu0  ;;  %v576_v31 = vmul.f32 %v563_v29, %v3063_v26 }
 0x1e8   :  { %v1893_v30 = vpop.f32.mrb[5].mxu0 }
 0x1e9   :  { %v1894_v32 = vadd.f32 %v1893_v30, %v1892_v28  ;;  %v1895_v33 = vpop.f32.mrb[6].mxu0  ;;  %v579_v38 = vadd.f32 %v576_v31, %v575_v35  ;;  %v2381_v35 = vld [vmem:[#allocation16 + $0x40] sm:$0xff]  }
 0x1ea   :  { %v1896_v34 = vpop.f32.mrb[7].mxu0 }
 0x1eb   :  { %v3070_v36 = vadd.f32 %v2044_v17, %v1894_v32  ;;  %v1897_v37 = vadd.f32 %v1896_v34, %v1895_v33  ;;  %v283_v32 = vld [vmem:[#allocation13] sm:$0x1] }
 0x1ed   :  { %v577_v39 = vmul.f32 %v3065_v27, %v3070_v36  ;;  %v3074_v40 = vadd.f32 %v2045_v22, %v1897_v37  ;;  %v284_v37 = vld [vmem:[#allocation14] sm:$0x1] }
 0x1ef   :  { %v580_v42 = vadd.f32 %v579_v38, %v577_v39  ;;  %v578_v43 = vmul.f32 %v573_v41, %v3074_v40  ;;  %v2383_v39 = vld [vmem:[#allocation16] sm:$0xff]  }
 0x1f1   :  { %v582_v44 = vsel %vm581_vm3, %v578_v43, 0.0  ;;  %v2386_v43 = vld [vmem:[#allocation16 + $0x8] sm:$0xff]  }
 0x1f2   :  { %v583_v45 = vadd.f32 %v582_v44, %v580_v42  ;;  %v2384_v42 = vld [vmem:[#allocation16 + $0x48] sm:$0xff]   ;;  %v2387_v44 = vld [vmem:[#allocation16 + $0x50] sm:$0xff]  }
 0x1f4   :  { %v584_v46 = vrot.slane %v583_v45, 4 }
 0x1f6   :  { %v585_v47 = vadd.f32 %v584_v46, %v583_v45  ;;  %v2389_v45 = vld [vmem:[#allocation16 + $0x10] sm:$0xff]   ;;  %v2390_v46 = vld [vmem:[#allocation16 + $0x58] sm:$0xff]  }
 0x1f8   :  { %v586_v48 = vrot.slane %v585_v47, 2 }
 0x1fa   :  { %v587_v49 = vadd.f32 %v586_v48, %v585_v47  ;;  %v2391_v47 = vld [vmem:[#allocation16 + $0xa0] sm:$0xff]  }
 0x1fb   :  { %v2393_v48 = vld [vmem:[#allocation16 + $0x60] sm:$0xff]  }
 0x1fc   :  { %v588_v50 = vrot.slane %v587_v49, 1 }
 0x1fe   :  { %v589_v51 = vadd.f32 %v588_v50, %v587_v49  ;;  %v2394_v49 = vld [vmem:[#allocation16 + $0xa8] sm:$0xff]   ;;  %v2395_v50 = vld [vmem:[#allocation16 + $0x20] sm:$0xff]  }
 0x200   :  { %2079 = vmatmul.mubr.f32.vlgmr.msra.gmra.mrb[8].mxu0 %v589_v51  ;;  %v2396_v51 = vld [vmem:[#allocation16 + $0x68] sm:$0xff]  }
 0x201   :  { %2122 = vmatpush3.msra.mxu0 %v3055_v13  ;;  %2123 = vmatprep.mubr.msk.f32.mxu0 %vm2751_vm2, %v2752_v12 }
 0x202   :  { %2126 = vmatprep.subr.mxu0 %v2752_v12 }
 0x2d3   :  { %v656_v52 = vpop.f32.mrb[8].mxu0 }
 0x2d4   :  { %v3082_v55 = vmul.f32 0.0025510204, %v656_v52  ;;  %v2080_v56 = vpop.f32.mrb[9].mxu0  ;;  %v2397_v52 = vld [vmem:[#allocation16 + $0xb0] sm:$0xff]  }
 0x2d5   :  { %v2399_v56 = vld [vmem:[#allocation16 + $0x70] sm:$0xff]  }
 0x2d6   :  { %2084 = vmatmul.mubr.msk.f32.vlgmr.msra.gmra.mrb[4].mxu1 %vm661_vm4, %v3082_v55 }
 0x2d7   :  { %2262 = vmatpush3.bf16.msra.mxu1 %v3017_v53  ;;  %2118 = vmatprep.mubr.msk.f32.mxu1 %vm2751_vm2, %v2752_v12  ;;  %v735_v53 = vlaneseq }
 0x2d8   :  { %2263 = vmatprep.subr.bf16.mxu1 %v2750_v54 }
 0x2db   :  { %2265 = vmatpush3.bf16.msra.mxu1 %v3022_v57  ;;  %v736_v57 = vshrl.u32 %v735_v53, 7  ;;  %v2400_v53 = vld [vmem:[#allocation16 + $0xb8] sm:$0xff]  }
 0x2dc   :  { %2266 = vmatprep.subr.bf16.mxu1 %v2750_v54 }
 0x2dd   :  { %v3103_v58 = vsub.s32 0, %v736_v57  ;;  %v2401_v57 = vld [vmem:[#allocation16 + $0x30] sm:$0xff]  }
 0x2df   :  { %2268 = vmatpush3.bf16.msra.mxu1 %v3026_v60 }
 0x2e0   :  { %2269 = vmatprep.subr.bf16.mxu1 %v2750_v54 }
 0x2e3   :  { %2271 = vmatpush3.bf16.msra.mxu1 %v3030_v63 }
 0x2e4   :  { %2272 = vmatprep.subr.bf16.mxu1 %v2750_v54 }
 0x2e7   :  { %2274 = vmatpush3.bf16.msra.mxu1 %v3034_v2 }
 0x2e8   :  { %2275 = vmatprep.subr.bf16.mxu1 %v2750_v54 }
 0x2eb   :  { %2277 = vmatpush3.bf16.msra.mxu1 %v3038_v5 }
 0x2ec   :  { %2278 = vmatprep.subr.bf16.mxu1 %v2750_v54 }
 0x2ef   :  { %2280 = vmatpush3.bf16.msra.mxu1 %v3042_v8 }
 0x2f0   :  { %2281 = vmatprep.subr.bf16.mxu1 %v2750_v54 }
 0x2f3   :  { %2283 = vmatpush3.bf16.msra.mxu1 %v3045_v11 }
 0x3a9   :  { %v731_v59 = vpop.f32.mrb[4].mxu1 }
 0x3aa   :  { %v738_v60 = vrot.slane %v731_v59, %v3103_v58  ;;  %v2085_v61 = vpop.f32.mrb[5].mxu1  ;;  %v2402_v59 = vld [vmem:[#allocation16 + $0x78] sm:$0xff]  }
 0x3ac   :  { %v739_v62 = vsub.f32 %v3061_v24, %v738_v60  ;;  %v740_v63 = vsub.f32 %v3063_v26, %v738_v60  ;;  %v741_v0 = vsub.f32 %v3070_v36, %v738_v60  ;;  %v742_v1 = vsub.f32 %v3074_v40, %v738_v60  ;;  %v2403_v60 = vld [vmem:[#allocation16 + $0x38] sm:$0xff]  }
 0x3ae   :  { %v743_v2 = vmul.f32 %v739_v62, %v3059_v14  ;;  %v744_v3 = vmul.f32 %v740_v63, %v563_v29  ;;  %v745_v4 = vmul.f32 %v741_v0, %v3065_v27  ;;  %v746_v5 = vmul.f32 %v742_v1, %v573_v41  ;;  %v2380_v14 = vld [vmem:[#allocation16 + $0x80] sm:$0xff]   ;;  %v2388_v27 = vld [vmem:[#allocation16 + $0x98] sm:$0xff]  }
 0x3af   :  { %2131 = vmatprep.subr.bf16.mxu1 %v2380_v14 }
 0x3b0   :  { %v747_v6 = vmul.f32 %v743_v2, %v743_v2  ;;  %v748_v7 = vmul.f32 %v744_v3, %v744_v3  ;;  %v750_v8 = vmul.f32 %v746_v5, %v746_v5  ;;  %v749_v9 = vmul.f32 %v745_v4, %v745_v4 }
 0x3b2   :  { %v751_v10 = vadd.f32 %v748_v7, %v747_v6  ;;  %v753_v15 = vsel %vm581_vm3, %v750_v8, 0.0 }
 0x3b4   :  { %v752_v11 = vadd.f32 %v751_v10, %v749_v9 }
 0x3b6   :  { %v754_v16 = vadd.f32 %v753_v15, %v752_v11 }
 0x3b8   :  { %v755_v17 = vrot.slane %v754_v16, 4 }
 0x3ba   :  { %v756_v18 = vadd.f32 %v755_v17, %v754_v16 }
 0x3bc   :  { %v757_v19 = vrot.slane %v756_v18, 2 }
 0x3be   :  { %v758_v20 = vadd.f32 %v757_v19, %v756_v18 }
 0x3c0   :  { %v759_v21 = vrot.slane %v758_v20, 1 }
 0x3c2   :  { %v760_v22 = vadd.f32 %v759_v21, %v758_v20 }
 0x3c4   :  { %2119 = vmatmul.mubr.f32.vlgmr.msra.gmra.mrb[6].mxu1 %v760_v22 }
 0x3c5   :  { %2132 = vmatpush3.bf16.msra.mxu1 %v2380_v14 }
 0x3c6   :  { %2133 = vmatprep.subr.bf16.mxu1 %v2382_v23 }
 0x3c9   :  { %2134 = vmatpush3.bf16.msra.mxu1 %v2382_v23 }
 0x3ca   :  { %2135 = vmatprep.subr.bf16.mxu1 %v2385_v25 }
 0x3cd   :  { %2136 = vmatpush3.bf16.msra.mxu1 %v2385_v25 }
 0x3ce   :  { %2137 = vmatprep.subr.bf16.mxu1 %v2388_v27 }
 0x3d1   :  { %2138 = vmatpush3.bf16.msra.mxu1 %v2388_v27 }
 0x3d2   :  { %2139 = vmatprep.subr.bf16.mxu1 %v2391_v47 }
 0x3d5   :  { %2140 = vmatpush3.bf16.msra.mxu1 %v2391_v47  ;;  %v1066_v47 = vld [vmem:[#allocation17 + $0x58] sm:$0xff] }
 0x3d6   :  { %2141 = vmatprep.subr.bf16.mxu1 %v2394_v49 }
 0x3d9   :  { %2142 = vmatpush3.bf16.msra.mxu1 %v2394_v49  ;;  %v1068_v49 = vld [vmem:[#allocation17 + $0x68] sm:$0xff] }
 0x3da   :  { %2143 = vmatprep.subr.bf16.mxu1 %v2397_v52 }
 0x3dd   :  { %2144 = vmatpush3.bf16.msra.mxu1 %v2397_v52  ;;  %v1070_v52 = vld [vmem:[#allocation17 + $0x78] sm:$0xff] }
 0x3de   :  { %2145 = vmatprep.subr.bf16.mxu1 %v2400_v53 }
 0x3e1   :  { %2146 = vmatpush3.bf16.msra.mxu1 %v2400_v53 }
 0x3e2   :  { %2186 = vmatprep.subr.mxu1 %v2752_v12 }
 0x497   :  { %v827_v28 = vpop.f32.mrb[6].mxu1 }
 0x498   :  { %v831_v29 = vmul.f32 0.0025510204, %v827_v28  ;;  %v2120_v30 = vpop.f32.mrb[7].mxu1 }
 0x499   :  { %v1056_v30 = vld [vmem:[#allocation17 + $0x8] sm:$0xff] }
 0x49a   :  { %v832_v31 = vadd.f32 1e-05, %v831_v29  ;;  %v1055_v29 = vld [vmem:[#allocation17] sm:$0xff] }
 0x49c   :  { %2404 = vrsqrt.f32 %v832_v31  ;;  %v3133_v31 = vpack.c.bf16 %v1056_v30, %v1055_v29 }
 0x4a6   :  { %v2405_v33 = vpop.eup %2404 }
 0x4a7   :  { %v834_v34 = vmul.f32 %v2405_v33, %v283_v32  ;;  %v1057_v32 = vld [vmem:[#allocation17 + $0x10] sm:$0xff]  ;;  %v1058_v33 = vld [vmem:[#allocation17 + $0x18] sm:$0xff] }
 0x4a9   :  { %2124 = vmatmul.mubr.msk.f32.vlgmr.msra.gmra.mrb[10].mxu0 %vm661_vm4, %v834_v34  ;;  %v835_v38 = vmul.f32 %v834_v34, %v3082_v55  ;;  %v2398_v55 = vld [vmem:[#allocation16 + $0x28] sm:$0xff]   ;;  %v3137_v34 = vpack.c.bf16 %v1058_v33, %v1057_v32 }
 0x4aa   :  { %2127 = vmatpush3.msra.mxu0 %v3055_v13  ;;  %2128 = vmatprep.mubr.msk.f32.mxu0 %vm2751_vm2, %v2752_v12  ;;  %v2392_v13 = vld [vmem:[#allocation16 + $0x18] sm:$0xff]  }
 0x4ab   :  { %v836_v41 = vsub.f32 %v284_v37, %v835_v38  ;;  %1948 = vmatprep.subr.bf16.mxu0 %v2381_v35  ;;  %v1059_v35 = vld [vmem:[#allocation17 + $0x20] sm:$0xff]  ;;  %v1060_v37 = vld [vmem:[#allocation17 + $0x28] sm:$0xff] }
 0x4ac   :  { %v3141_v38 = vpack.c.bf16 %v1060_v37, %v1059_v35 }
 0x4ad   :  { %2129 = vmatmul.mubr.msk.f32.vlgmr.msra.gmra.mrb[12].mxu0 %vm661_vm4, %v836_v41  ;;  %v1062_v41 = vld [vmem:[#allocation17 + $0x38] sm:$0xff] }
 0x4ae   :  { %1949 = vmatpush3.bf16.msra.mxu0 %v2383_v39  ;;  %v1061_v39 = vld [vmem:[#allocation17 + $0x30] sm:$0xff] }
 0x4af   :  { %1950 = vmatprep.subr.bf16.mxu0 %v2384_v42  ;;  %v3145_v42 = vpack.c.bf16 %v1062_v41, %v1061_v39 }
 0x4b2   :  { %1951 = vmatpush3.bf16.msra.mxu0 %v2386_v43  ;;  %v1063_v43 = vld [vmem:[#allocation17 + $0x40] sm:$0xff] }
 0x4b3   :  { %1952 = vmatprep.subr.bf16.mxu0 %v2387_v44  ;;  %v1064_v44 = vld [vmem:[#allocation17 + $0x48] sm:$0xff] }
 0x4b6   :  { %1953 = vmatpush3.bf16.msra.mxu0 %v2389_v45  ;;  %v3149_v45 = vpack.c.bf16 %v1064_v44, %v1063_v43 }
 0x4b7   :  { %1954 = vmatprep.subr.bf16.mxu0 %v2390_v46  ;;  %v1065_v46 = vld [vmem:[#allocation17 + $0x50] sm:$0xff] }
 0x4ba   :  { %1955 = vmatpush3.bf16.msra.mxu0 %v2392_v13  ;;  %v3153_v13 = vpack.c.bf16 %v1066_v47, %v1065_v46 }
 0x4bb   :  { %1956 = vmatprep.subr.bf16.mxu0 %v2393_v48  ;;  %v1067_v48 = vld [vmem:[#allocation17 + $0x60] sm:$0xff] }
 0x4be   :  { %1957 = vmatpush3.bf16.msra.mxu0 %v2395_v50  ;;  %v3157_v50 = vpack.c.bf16 %v1068_v49, %v1067_v48 }
 0x4bf   :  { %1958 = vmatprep.subr.bf16.mxu0 %v2396_v51  ;;  %v1069_v51 = vld [vmem:[#allocation17 + $0x70] sm:$0xff] }
 0x4c2   :  { %1959 = vmatpush3.bf16.msra.mxu0 %v2398_v55  ;;  %v3160_v55 = vpack.c.bf16 %v1070_v52, %v1069_v51 }
 0x4c3   :  { %1960 = vmatprep.subr.bf16.mxu0 %v2399_v56  ;;  %v3165_v56 = vld [vmem:[#allocation19] sm:$0xff] }
 0x4c6   :  { %1961 = vmatpush3.bf16.msra.mxu0 %v2401_v57 }
 0x4c7   :  { %1962 = vmatprep.subr.bf16.mxu0 %v2402_v59 }
 0x4ca   :  { %1963 = vmatpush3.bf16.msra.mxu0 %v2403_v60 }
 0x4cb   :  { %2284 = vmatprep.subr.bf16.mxu0 %v2750_v54 }
 0x57c   :  { %v906_v61 = vpop.f32.mrb[10].mxu0 }
 0x57d   :  { %v986_v62 = vrot.slane %v906_v61, %v3103_v58  ;;  %v2125_v63 = vpop.f32.mrb[11].mxu0 }
 0x57f   :  { %v987_v0 = vmul.f32 %v986_v62, %v3061_v24  ;;  %v988_v2 = vmul.f32 %v986_v62, %v3063_v26  ;;  %v989_v3 = vmul.f32 %v986_v62, %v3070_v36  ;;  %v990_v4 = vmul.f32 %v986_v62, %v3074_v40 }
 0x580   :  { %v979_v1 = vpop.f32.mrb[12].mxu0 }
 0x581   :  { %v994_v5 = vrot.slane %v979_v1, %v3103_v58  ;;  %v2130_v6 = vpop.f32.mrb[13].mxu0 }
 0x583   :  { %v995_v7 = vadd.f32 %v994_v5, %v987_v0  ;;  %v996_v8 = vadd.f32 %v994_v5, %v988_v2  ;;  %v997_v9 = vadd.f32 %v994_v5, %v989_v3  ;;  %v998_v10 = vadd.f32 %v994_v5, %v990_v4  ;;  %v1345_v5 = vpop.permute.xlu0 %1344 }
 0x585   :  { %v999_v11 = vmax.f32 %v995_v7, 0.0  ;;  %v1000_v15 = vmax.f32 %v996_v8, 0.0  ;;  %v1001_v16 = vmax.f32 %v997_v9, 0.0  ;;  %v1002_v17 = vmax.f32 %v998_v10, 0.0  ;;  %v1350_v7 = vpop.permute.xlu1 %1349 }
 0x587   :  { %v1074_v18 = vpack.c.bf16 %v1000_v15, %v999_v11  ;;  %v1075_v24 = vpack.c.bf16 %v1002_v17, %v1001_v16 }
 0x589   :  { %v1095_v19 = vrot.slane %v1074_v18, 1  ;;  %v1096_v20 = vrot.slane %v1075_v24, 1  ;;  %v1079_v26 = vshll.u32 %v1074_v18, 16  ;;  %v1084_v21 = vshll.u32 %v1075_v24, 16 }
 0x58a   :  { %v1077_v40 = vshrl.u32 %v1074_v18, 16  ;;  %v1088_v25 = vshrl.u32 %v1075_v24, 16 }
 0x58b   :  { %v1097_v36 = vsel %vm307_vm1, %v1095_v19, %v1096_v20  ;;  %v1081_v22 = vrot.slane %v1079_v26, 1  ;;  %v1086_v14 = vrot.slane %v1084_v21, 1  ;;  %v1360_v21 = vpop.permute.xlu1 %1359 }
 0x58c   :  { %2147 = vmatprep.mubr.bf16.mxu1 %v1097_v36 }
 0x58d   :  { %2148 = vmatmul.mubr.bf16.vlgmr.msra.gmra.mrb[8].mxu1 %v1096_v20  ;;  %v1082_v23 = vor.u32 %v1081_v22, %v1077_v40  ;;  %v1090_v28 = vor.u32 %v1088_v25, %v1086_v14 }
 0x58e   :  { %2188 = vmatprep.mubr.msk.f32.mxu1 %vm2751_vm2, %v2752_v12  ;;  %2187 = vmatpush3.msra.mxu1 %v3165_v56 }
 0x58f   :  { %v1087_v27 = vsel %vm287_vm0, %v1082_v23, %v1086_v14  ;;  %2308 = vmatprep.subr.bf16.mxu1 %v2750_v54 }
 0x590   :  { %1276 = vmatprep.mubr.bf16.mxu0 %v1087_v27 }
 0x591   :  { %1277 = vmatmul.mubr.bf16.vlgmr.msra.gmra.mrb[16].mxu0 %v1074_v18 }
 0x592   :  { %1284 = vmatprep.mubr.bf16.mxu0 %v1090_v28  ;;  %2286 = vmatpush3.bf16.msra.mxu0 %v3133_v31 }
 0x593   :  { %2287 = vmatprep.subr.bf16.mxu0 %v2750_v54 }
 0x596   :  { %2289 = vmatpush3.bf16.msra.mxu0 %v3137_v34 }
 0x597   :  { %2290 = vmatprep.subr.bf16.mxu0 %v2750_v54 }
 0x599   :  { %1285 = vmatmul.mubr.bf16.gmra.mrb[20].mxu0 %v1075_v24  ;;  %v1355_v24 = vpop.permute.xlu0 %1354 }
 0x59a   :  { %2183 = vmatprep.mubr.msk.f32.mxu0 %vm2751_vm2, %v2752_v12  ;;  %2292 = vmatpush3.bf16.msra.mxu0 %v3141_v38 }
 0x59b   :  { %2293 = vmatprep.subr.bf16.mxu0 %v2750_v54 }
 0x59e   :  { %2295 = vmatpush3.bf16.msra.mxu0 %v3145_v42 }
 0x59f   :  { %2296 = vmatprep.subr.bf16.mxu0 %v2750_v54 }
 0x5a2   :  { %2298 = vmatpush3.bf16.msra.mxu0 %v3149_v45 }
 0x5a3   :  { %2299 = vmatprep.subr.bf16.mxu0 %v2750_v54 }
 0x5a6   :  { %2301 = vmatpush3.bf16.msra.mxu0 %v3153_v13 }
 0x5a7   :  { %2302 = vmatprep.subr.bf16.mxu0 %v2750_v54 }
 0x5aa   :  { %2304 = vmatpush3.bf16.msra.mxu0 %v3157_v50 }
 0x5ab   :  { %2305 = vmatprep.subr.bf16.mxu0 %v2750_v54 }
 0x5ae   :  { %2307 = vmatpush3.bf16.msra.mxu0 %v3160_v55 }
 0x5af   :  { %2226 = vmatprep.subr.mxu0 %v2752_v12 }
 0x660   :  { %v2149_v53 = vpop.f32.mrb[8].mxu1 }
 0x661   :  { %v1327_v57 = vpop.f32.mrb[9].mxu1 }
 0x662   :  { %v2150_v59 = vpop.f32.mrb[10].mxu1 }
 0x663   :  { %v1330_v60 = vpop.f32.mrb[11].mxu1 }
 0x664   :  { %v1964_v61 = vpop.f32.mrb[16].mxu0 }
 0x665   :  { %v1965_v62 = vpop.f32.mrb[17].mxu0 }
 0x666   :  { %v1966_v63 = vadd.f32 %v1965_v62, %v1964_v61  ;;  %v1967_v0 = vpop.f32.mrb[18].mxu0 }
 0x667   :  { %v1968_v1 = vpop.f32.mrb[19].mxu0 }
 0x668   :  { %v3169_v2 = vadd.f32 %v1966_v63, %v1327_v57  ;;  %v1969_v3 = vadd.f32 %v1968_v1, %v1967_v0 }
 0x66a   :  { %v3171_v4 = vadd.f32 %v1969_v3, %v1330_v60  ;;  %v1362_v16 = vmul.f32 %v1345_v5, %v3169_v2  ;;  %v1072_v3 = vld [vmem:[#allocation20] sm:$0x1] }
 0x66c   :  { %v1970_v6 = vpop.f32.mrb[20].mxu0  ;;  %v1363_v9 = vmul.f32 %v1350_v7, %v3171_v4 }
 0x66d   :  { %v1971_v8 = vpop.f32.mrb[21].mxu0 }
 0x66e   :  { %v1972_v10 = vadd.f32 %v1971_v8, %v1970_v6  ;;  %v1973_v11 = vpop.f32.mrb[22].mxu0  ;;  %v1366_v19 = vadd.f32 %v1363_v9, %v1362_v16 }
 0x66f   :  { %v1974_v15 = vpop.f32.mrb[23].mxu0 }
 0x670   :  { %v3175_v17 = vadd.f32 %v2149_v53, %v1972_v10  ;;  %v1975_v18 = vadd.f32 %v1974_v15, %v1973_v11 }
 0x672   :  { %v1364_v20 = vmul.f32 %v1355_v24, %v3175_v17  ;;  %v3178_v26 = vadd.f32 %v2150_v59, %v1975_v18 }
 0x674   :  { %v1367_v36 = vadd.f32 %v1366_v19, %v1364_v20  ;;  %v1365_v40 = vmul.f32 %v1360_v21, %v3178_v26 }
 0x676   :  { %v1369_v22 = vsel %vm1368_vm5, %v1365_v40, 0.0 }
 0x677   :  { %v1370_v14 = vadd.f32 %v1369_v22, %v1367_v36 }
 0x679   :  { %v1371_v23 = vrot.slane %v1370_v14, 4 }
 0x67b   :  { %v1372_v25 = vadd.f32 %v1371_v23, %v1370_v14 }
 0x67d   :  { %v1373_v27 = vrot.slane %v1372_v25, 2 }
 0x67f   :  { %v1374_v28 = vadd.f32 %v1373_v27, %v1372_v25 }
 0x681   :  { %v1375_v29 = vrot.slane %v1374_v28, 1 }
 0x683   :  { %v1376_v30 = vadd.f32 %v1375_v29, %v1374_v28 }
 0x685   :  { %2184 = vmatmul.mubr.f32.vlgmr.msra.gmra.mrb[14].mxu0 %v1376_v30 }
 0x686   :  { %2227 = vmatpush3.msra.mxu0 %v3165_v56  ;;  %2228 = vmatprep.mubr.msk.f32.mxu0 %vm2751_vm2, %v2752_v12 }
 0x687   :  { %2231 = vmatprep.subr.mxu0 %v2752_v12 }
 0x758   :  { %v1443_v32 = vpop.f32.mrb[14].mxu0 }
 0x759   :  { %v1447_v33 = vmul.f32 0.0034722222, %v1443_v32  ;;  %v2185_v35 = vpop.f32.mrb[15].mxu0 }
 0x75b   :  { %2189 = vmatmul.mubr.msk.f32.vlgmr.msra.gmra.mrb[12].mxu1 %vm661_vm4, %v1447_v33 }
 0x75c   :  { %2310 = vmatpush3.bf16.msra.mxu1 %v3133_v31  ;;  %2223 = vmatprep.mubr.msk.f32.mxu1 %vm2751_vm2, %v2752_v12 }
 0x75d   :  { %2311 = vmatprep.subr.bf16.mxu1 %v2750_v54 }
 0x760   :  { %2313 = vmatpush3.bf16.msra.mxu1 %v3137_v34 }
 0x761   :  { %2314 = vmatprep.subr.bf16.mxu1 %v2750_v54 }
 0x764   :  { %2316 = vmatpush3.bf16.msra.mxu1 %v3141_v38 }
 0x765   :  { %2317 = vmatprep.subr.bf16.mxu1 %v2750_v54 }
 0x768   :  { %2319 = vmatpush3.bf16.msra.mxu1 %v3145_v42 }
 0x769   :  { %2320 = vmatprep.subr.bf16.mxu1 %v2750_v54 }
 0x76c   :  { %2322 = vmatpush3.bf16.msra.mxu1 %v3149_v45 }
 0x76d   :  { %2323 = vmatprep.subr.bf16.mxu1 %v2750_v54 }
 0x770   :  { %2325 = vmatpush3.bf16.msra.mxu1 %v3153_v13 }
 0x771   :  { %2326 = vmatprep.subr.bf16.mxu1 %v2750_v54 }
 0x774   :  { %2328 = vmatpush3.bf16.msra.mxu1 %v3157_v50 }
 0x775   :  { %2329 = vmatprep.subr.bf16.mxu1 %v2750_v54 }
 0x778   :  { %2331 = vmatpush3.bf16.msra.mxu1 %v3160_v55 }
 0x82e   :  { %v1517_v31 = vpop.f32.mrb[12].mxu1 }
 0x82f   :  { %v1524_v34 = vrot.slane %v1517_v31, %v3103_v58  ;;  %v2190_v37 = vpop.f32.mrb[13].mxu1 }
 0x831   :  { %v1525_v38 = vsub.f32 %v3169_v2, %v1524_v34  ;;  %v1526_v39 = vsub.f32 %v3171_v4, %v1524_v34  ;;  %v1527_v41 = vsub.f32 %v3175_v17, %v1524_v34  ;;  %v1528_v42 = vsub.f32 %v3178_v26, %v1524_v34 }
 0x833   :  { %v1529_v43 = vmul.f32 %v1525_v38, %v1345_v5  ;;  %v1530_v44 = vmul.f32 %v1526_v39, %v1350_v7  ;;  %v1531_v45 = vmul.f32 %v1527_v41, %v1355_v24  ;;  %v1532_v46 = vmul.f32 %v1528_v42, %v1360_v21  ;;  %v1073_v7 = vld [vmem:[#allocation22] sm:$0x1] }
 0x835   :  { %v1533_v47 = vmul.f32 %v1529_v43, %v1529_v43  ;;  %v1534_v54 = vmul.f32 %v1530_v44, %v1530_v44  ;;  %v1536_v13 = vmul.f32 %v1532_v46, %v1532_v46  ;;  %v1535_v48 = vmul.f32 %v1531_v45, %v1531_v45 }
 0x837   :  { %v1537_v49 = vadd.f32 %v1534_v54, %v1533_v47  ;;  %v1539_v51 = vsel %vm1368_vm5, %v1536_v13, 0.0 }
 0x839   :  { %v1538_v50 = vadd.f32 %v1537_v49, %v1535_v48 }
 0x83b   :  { %v1540_v52 = vadd.f32 %v1539_v51, %v1538_v50 }
 0x83d   :  { %v1541_v55 = vrot.slane %v1540_v52, 4 }
 0x83f   :  { %v1542_v53 = vadd.f32 %v1541_v55, %v1540_v52 }
 0x841   :  { %v1543_v57 = vrot.slane %v1542_v53, 2 }
 0x843   :  { %v1544_v59 = vadd.f32 %v1543_v57, %v1542_v53 }
 0x845   :  { %v1545_v60 = vrot.slane %v1544_v59, 1 }
 0x847   :  { %v1546_v61 = vadd.f32 %v1545_v60, %v1544_v59 }
 0x849   :  { %2224 = vmatmul.mubr.f32.vlgmr.msra.gmra.mrb[14].mxu1 %v1546_v61 }
 0x91c   :  { %v1613_v62 = vpop.f32.mrb[14].mxu1 }
 0x91d   :  { %v1617_v63 = vmul.f32 0.0034722222, %v1613_v62  ;;  %v2225_v0 = vpop.f32.mrb[15].mxu1 }
 0x91f   :  { %v1618_v1 = vadd.f32 1e-05, %v1617_v63 }
 0x921   :  { %2406 = vrsqrt.f32 %v1618_v1 }
 0x92b   :  { %v2407_v5 = vpop.eup %2406 }
 0x92c   :  { %v1620_v6 = vmul.f32 %v2407_v5, %v1072_v3 }
 0x92e   :  { %2229 = vmatmul.mubr.msk.f32.vlgmr.msra.gmra.mrb[24].mxu0 %vm661_vm4, %v1620_v6  ;;  %v1621_v8 = vmul.f32 %v1620_v6, %v1447_v33 }
 0x92f   :  { %2232 = vmatpush3.msra.mxu0 %v3165_v56  ;;  %2233 = vmatprep.mubr.msk.f32.mxu0 %vm2751_vm2, %v2752_v12 }
 0x930   :  { %v1622_v9 = vsub.f32 %v1073_v7, %v1621_v8 }
 0x932   :  { %2234 = vmatmul.mubr.msk.f32.vlgmr.msra.gmra.mrb[26].mxu0 %vm661_vm4, %v1622_v9 }
 0xa01   :  { %v1692_v10 = vpop.f32.mrb[24].mxu0 }
 0xa02   :  { %v1772_v11 = vrot.slane %v1692_v10, %v3103_v58  ;;  %v2230_v15 = vpop.f32.mrb[25].mxu0 }
 0xa04   :  { %v1773_v16 = vmul.f32 %v1772_v11, %v3169_v2  ;;  %v1774_v24 = vmul.f32 %v1772_v11, %v3171_v4  ;;  %v1775_v19 = vmul.f32 %v1772_v11, %v3175_v17  ;;  %v1776_v20 = vmul.f32 %v1772_v11, %v3178_v26 }
 0xa05   :  { %v1765_v18 = vpop.f32.mrb[26].mxu0 }
 0xa06   :  { %v1780_v56 = vrot.slane %v1765_v18, %v3103_v58  ;;  %v2235_v21 = vpop.f32.mrb[27].mxu0 }
 0xa08   :  { %v1781_v12 = vadd.f32 %v1780_v56, %v1773_v16  ;;  %v1782_v36 = vadd.f32 %v1780_v56, %v1774_v24  ;;  %v1783_v40 = vadd.f32 %v1780_v56, %v1775_v19  ;;  %v1784_v22 = vadd.f32 %v1780_v56, %v1776_v20 }
 0xa0a   :  { %v1785_v14 = vmax.f32 %v1781_v12, 0.0  ;;  %v1786_v23 = vmax.f32 %v1782_v36, 0.0  ;;  %v1787_v25 = vmax.f32 %v1783_v40, 0.0  ;;  %v1788_v2 = vmax.f32 %v1784_v22, 0.0 }
 0xa0c   :  { %1789 = vst [vmem:[#allocation23] sm:$0xff] %v1785_v14  ;;  %1790 = vst [vmem:[#allocation23 + $0x8] sm:$0xff] %v1786_v23 }
 0xa0d   :  { %1791 = vst [vmem:[#allocation23 + $0x10] sm:$0xff] %v1787_v25  ;;  %1792 = vst [vmem:[#allocation23 + $0x18] sm:$0xf] %v1788_v2 }
 0xa0e   :  { %2705 = shalt.err (!%p2702_p10)
}
 0xa0f   :  { %s2706_s27 = scalar_lea.hbm %s3249_s13, 512 }
 0xa10   :  { %p2707_p11 = scmp.ne.s32.totalorder %s3249_s13, %s2706_s27  ;;  %p2710_p12 = scmp.lt.u32.totalorder %s2706_s27, %s3249_s13 }
 0xa12   :  { %p2712_p13 = pnand %p2710_p12, %p2707_p11 }
 0xa14   :  { %2715 = shalt.err (!%p2712_p13)
}
 0xa15   :  { %1804 = dma.vmem_to_hbm [thread:$0]  %s1799_s9, 512, %s3249_s13, [#allocation4], %s2734_s20, %s2734_s20, %s2735_s21  }
 0xa16   :  { %2730 = dma.done.wait [#allocation4], 512  }
 0xa17   :  { %2731 = vsyncadd [#allocation4], 4294966784 }
 0xa18   :  { %1808 = vsyncpa [#allocation3], 1 }
 0xa19   :  { %1809 = vsyncpa [#allocation6], 1 }
 0xa1a   :  { %1810 = vsyncpa [#allocation9], 1 }
 0xa1b   :  { %1811 = vsyncpa [#allocation12], 1 }
 0xa1c   :  { %1812 = vsyncpa [#allocation15], 1 }
 0xa1d   :  { %1813 = vsyncpa [#allocation18], 1 }
 0xa1e   :  { %1814 = vsyncpa [#allocation21], 1 }
 0xa1f   :  { %1815 = vsyncpa [#allocation4], 1 }

</bundles_post_ra>
